<compile_context>
chip_gen: v6e
topology: v6e:2x2x1
jax: 0.10.0
libtpu: 0.0.40
codegen_flags: <defaults>
</compile_context>

<pallas_src>
import functools

import jax
import jax.numpy as jnp
from jax import lax
from jax.experimental import pallas as pl
from jax.experimental.pallas import tpu as pltpu


def _round_up(x, m):
    return (x + m - 1) // m * m


def _gru_decoder_kernel(x_ref, h0_ref, w_ih_ref, w_hh_ref, b_gi_ref, b_hn_ref,
                        w_dec_ref, b_dec_ref,
                        y_ref, h_out_ref,
                        h_carry, gi_scratch, hs_scratch,
                        *, seq_len, t_chunk):
    """One grid step processes one chunk of `t_chunk` time steps.

    x_ref     : (T*Bp, Hp)  bf16  embedded inputs for this chunk (time-major)
    h0_ref    : (Bp, Hp)    f32   initial hidden state (used at chunk 0 only)
    w_ih_ref  : (Hp, 3Hp)   bf16  input->gate weights (gate blocks Hp-aligned)
    w_hh_ref  : (Hp, 3Hp)   bf16  hidden->gate weights
    b_gi_ref  : (1, 3Hp)    f32   folded bias [b_ih_r+b_hh_r, b_ih_z+b_hh_z, b_ih_n]
    b_hn_ref  : (1, Hp)     f32   b_hh_n (stays inside the r-multiplied term)
    w_dec_ref : (Hp, Op)    bf16  decoder weights
    b_dec_ref : (1, Op)     f32   decoder bias
    y_ref     : (T*Bp, Op)  f32   decoder outputs for this chunk
    h_out_ref : (Bp, Hp)    f32   final hidden state (resident across grid)
    h_carry   : (Bp, Hp)    f32   hidden state carried across chunks
    gi_scratch: (T*Bp, 3Hp) f32   per-chunk precomputed input gates
    hs_scratch: (T*Bp, Hp)  bf16  per-chunk hidden states (decoder input)
    """
    Bp, Hp = h0_ref.shape
    chunk = pl.program_id(0)

    # ---- carry init on the first chunk (accumulator pattern) ----
    @pl.when(chunk == 0)
    def _():
        h_carry[...] = h0_ref[...]

    # ---- Phase 1: hoisted input->gates matmul for the whole chunk (bf16 MXU,
    #      f32 accumulation), off the serial critical path.
    gi_scratch[...] = (
        jnp.dot(x_ref[...], w_ih_ref[...], preferred_element_type=jnp.float32)
        + b_gi_ref[...])

    # Hoisted out of the loop: JAX does not CSE broadcast_in_dim.
    b_hn_b = jnp.broadcast_to(b_hn_ref[...], (Bp, Hp))
    h = h_carry[...]

    # ---- Phase 2: serial recurrence; only h @ w_hh is on the critical path.
    # TODO(synk): make w_hh weight-stationary on the MXU via
    # pltpu.matmul_push_rhs / matmul_acc_lhs / matmul_pop to avoid re-pushing
    # the (Hp,3Hp) RHS every step of the Bp=8-row LHS.
    def step(t, h):
        if isinstance(t, int):                       # statically unrolled path
            off = t * Bp
        else:                                        # fori_loop path
            off = pl.multiple_of(t * Bp, Bp)
        gi_t = gi_scratch[pl.ds(off, Bp), :]         # (Bp, 3Hp), free view
        gh = jnp.dot(h.astype(w_hh_ref.dtype), w_hh_ref[...],
                     preferred_element_type=jnp.float32)
        # Gate slices land exactly on 128-lane block boundaries -> free views.
        r = jax.nn.sigmoid(gi_t[:, :Hp] + gh[:, :Hp])
        z = jax.nn.sigmoid(gi_t[:, Hp:2 * Hp] + gh[:, Hp:2 * Hp])
        n = jnp.tanh(gi_t[:, 2 * Hp:] + r * (gh[:, 2 * Hp:] + b_hn_b))
        h_new = (1.0 - z) * n + z * h
        hs_scratch[pl.ds(off, Bp), :] = h_new.astype(hs_scratch.dtype)

        # Snapshot the true final hidden state (the time axis may be padded to
        # a multiple of the chunk size; padded trailing steps must not leak).
        @pl.when(chunk * t_chunk + t == seq_len - 1)
        def _():
            h_out_ref[...] = h_new

        return h_new

    if t_chunk <= 8:
        # Small static unroll: bounded live ranges, full LLO visibility.
        for t in range(t_chunk):
            h = step(t, h)
    else:
        h = lax.fori_loop(0, t_chunk, step, h, unroll=2)

    h_carry[...] = h

    # ---- Phase 3: hoisted decoder matmul over the chunk's hidden states.
    y_ref[...] = (
        jnp.dot(hs_scratch[...], w_dec_ref[...],
                preferred_element_type=jnp.float32)
        + b_dec_ref[...]).astype(y_ref.dtype)


@jax.jit
def rnn_forward(tokens, hidden, params):
    """Mirrors RNN.forward(input, hidden): embedding -> GRU -> Linear.

    tokens : (B, S) int32 token ids
    hidden : (n_layers=1, B, H) float32
    returns (output (B, S, O), hidden (1, B, H))
    """
    emb_w, w_ih, w_hh, b_ih, b_hh, w_dec, b_dec = (
        params["embedding"], params["w_ih"], params["w_hh"],
        params["b_ih"], params["b_hh"], params["w_dec"], params["b_dec"])

    B, S = tokens.shape
    H = emb_w.shape[1]
    O = w_dec.shape[0]

    # TPU-friendly padded sizes: last dim to 128 lanes, batch to 8 sublanes.
    Hp = _round_up(H, 128)
    Op = _round_up(O, 128)
    Bp = _round_up(B, 8)

    # Sequence chunking: grid over chunks of T time steps so BlockSpec
    # double-buffering overlaps DMA with compute and VMEM stays per-chunk.
    T = min(S, 16)
    n_chunks = (S + T - 1) // T
    Sp = n_chunks * T

    # bf16 is the native MXU dtype on v5e/v6e/v7x; accumulation stays f32 via
    # preferred_element_type, gate math stays f32.
    mxu_dt = jnp.bfloat16

    # Embedding lookup directly in time-major packed layout (Sp*Bp, Hp): the
    # gather itself produces the layout the kernel wants (no transpose pass).
    tok_t = jnp.pad(jnp.transpose(tokens), ((0, Sp - S), (0, Bp - B)))  # (Sp, Bp)
    x = jnp.take(emb_w, tok_t.reshape(-1), axis=0)                      # (Sp*Bp, H)
    x = jnp.pad(x, ((0, 0), (0, Hp - H))).astype(mxu_dt)                # (Sp*Bp, Hp)
    # TODO(synk): for tiny vocab (V << S*B) precompute gi_table = emb @ w_ih + b
    # outside the kernel and gather gi per token, dropping Phase 1 and x.

    h0 = jnp.pad(hidden[0], ((0, Bp - B), (0, Hp - H))).astype(jnp.float32)

    # Split weights per gate, pad each gate block to (Hp, Hp) and re-concat so
    # every gate starts on a 128-lane boundary.  PyTorch layout: (3H, H), r/z/n.
    def pack_gate_weights(w):
        gates = [w[g * H:(g + 1) * H, :].T for g in range(3)]           # (H, H)
        gates = [jnp.pad(g, ((0, Hp - H), (0, Hp - H))) for g in gates]
        return jnp.concatenate(gates, axis=1).astype(mxu_dt)            # (Hp, 3Hp)

    w_ih_p = pack_gate_weights(w_ih)
    w_hh_p = pack_gate_weights(w_hh)

    def pad_vec(v):
        return jnp.pad(v, (0, Hp - H))

    # Fold b_ih+b_hh for r and z into the hoisted input-gate bias; keep b_hh_n
    # separate (it sits inside the r-multiplied term in torch.nn.GRU).
    b_gi = jnp.concatenate([
        pad_vec(b_ih[:H] + b_hh[:H]),
        pad_vec(b_ih[H:2 * H] + b_hh[H:2 * H]),
        pad_vec(b_ih[2 * H:]),
    ])[None, :].astype(jnp.float32)                                     # (1, 3Hp)
    b_hn = pad_vec(b_hh[2 * H:])[None, :].astype(jnp.float32)           # (1, Hp)

    w_dec_p = jnp.pad(w_dec.T, ((0, Hp - H), (0, Op - O))).astype(mxu_dt)   # (Hp, Op)
    b_dec_p = jnp.pad(b_dec, (0, Op - O))[None, :].astype(jnp.float32)      # (1, Op)

    # Scoped-VMEM limit sized to the actual resident footprint (+headroom),
    # capped at v7x's 64 MiB physical VMEM.
    db = 2  # BlockSpec double-buffering
    resident = (
        db * T * Bp * Hp * 2            # x chunk (bf16)
        + db * T * Bp * Op * 4          # y chunk (f32)
        + db * Bp * Hp * 4 * 2          # h0 + h_out
        + db * Hp * 3 * Hp * 2 * 2      # w_ih + w_hh (bf16)
        + db * Hp * Op * 2              # w_dec (bf16)
        + db * (4 * Hp + Op) * 4        # biases
        + T * Bp * 3 * Hp * 4           # gi scratch (f32)
        + T * Bp * Hp * 2               # hs scratch (bf16)
        + Bp * Hp * 4                   # h carry
    )
    vmem_limit = int(min(max(2 * resident, 32 * 1024 * 1024), 64 * 1024 * 1024))

    kernel = functools.partial(_gru_decoder_kernel, seq_len=S, t_chunk=T)

    # TODO(synk): on v7x, split the (embarrassingly S-parallel) Phase-1/3
    # matmuls across both TensorCores via core_map; the recurrence stays serial.
    y, h_last = pl.pallas_call(
        kernel,
        out_shape=(
            jax.ShapeDtypeStruct((Sp * Bp, Op), jnp.float32),
            jax.ShapeDtypeStruct((Bp, Hp), jnp.float32),
        ),
        grid_spec=pltpu.PrefetchScalarGridSpec(
            num_scalar_prefetch=0,
            grid=(n_chunks,),
            in_specs=[
                pl.BlockSpec((T * Bp, Hp), lambda i: (i, 0)),      # x chunk
                pl.BlockSpec((Bp, Hp), lambda i: (0, 0)),          # h0
                pl.BlockSpec((Hp, 3 * Hp), lambda i: (0, 0)),      # w_ih
                pl.BlockSpec((Hp, 3 * Hp), lambda i: (0, 0)),      # w_hh
                pl.BlockSpec((1, 3 * Hp), lambda i: (0, 0)),       # b_gi (folded)
                pl.BlockSpec((1, Hp), lambda i: (0, 0)),           # b_hh_n
                pl.BlockSpec((Hp, Op), lambda i: (0, 0)),          # w_dec
                pl.BlockSpec((1, Op), lambda i: (0, 0)),           # b_dec
            ],
            out_specs=[
                pl.BlockSpec((T * Bp, Op), lambda i: (i, 0)),      # y chunk
                pl.BlockSpec((Bp, Hp), lambda i: (0, 0)),          # h_out (resident)
            ],
            scratch_shapes=[
                pltpu.VMEM((Bp, Hp), jnp.float32),                 # h carry
                pltpu.VMEM((T * Bp, 3 * Hp), jnp.float32),         # gi (chunk)
                pltpu.VMEM((T * Bp, Hp), mxu_dt),                  # hs (chunk, bf16)
            ],
        ),
        compiler_params=pltpu.CompilerParams(
            dimension_semantics=("arbitrary",),
            vmem_limit_bytes=vmem_limit),
    )(x, h0, w_ih_p, w_hh_p, b_gi, b_hn, w_dec_p, b_dec_p)

    # Un-pad / back to batch_first.
    output = jnp.transpose(y.reshape(Sp, Bp, Op)[:S, :B, :O], (1, 0, 2))  # (B, S, O)
    hidden_out = h_last[:B, :H][None, :, :]                              # (1, B, H)
    return output, hidden_out


def rnn_forward_ref(tokens, hidden, params):
    """Pure-JAX f32 reference replicating torch.nn.GRU semantics (gate order r,z,n)."""
    emb_w, w_ih, w_hh, b_ih, b_hh, w_dec, b_dec = (
        params["embedding"], params["w_ih"], params["w_hh"],
        params["b_ih"], params["b_hh"], params["w_dec"], params["b_dec"])
    H = emb_w.shape[1]
    x = jnp.take(emb_w, tokens, axis=0)           # (B, S, H)
    h = hidden[0]

    def step(h, x_t):
        gi = x_t @ w_ih.T + b_ih
        gh = h @ w_hh.T + b_hh
        i_r, i_z, i_n = gi[:, :H], gi[:, H:2 * H], gi[:, 2 * H:]
        h_r, h_z, h_n = gh[:, :H], gh[:, H:2 * H], gh[:, 2 * H:]
        r = jax.nn.sigmoid(i_r + h_r)
        z = jax.nn.sigmoid(i_z + h_z)
        n = jnp.tanh(i_n + r * h_n)
        h_new = (1.0 - z) * n + z * h
        return h_new, h_new

    h_last, hs = lax.scan(step, h, jnp.transpose(x, (1, 0, 2)))
    out = jnp.einsum("sbh,oh->sbo", hs, w_dec) + b_dec
    return jnp.transpose(out, (1, 0, 2)), h_last[None]


def init_params(key, input_size, hidden_size, output_size):
    ks = jax.random.split(key, 7)
    s = 1.0 / jnp.sqrt(hidden_size)
    return {
        "embedding": jax.random.normal(ks[0], (input_size, hidden_size), jnp.float32),
        "w_ih": jax.random.uniform(ks[1], (3 * hidden_size, hidden_size), jnp.float32, -s, s),
        "w_hh": jax.random.uniform(ks[2], (3 * hidden_size, hidden_size), jnp.float32, -s, s),
        "b_ih": jax.random.uniform(ks[3], (3 * hidden_size,), jnp.float32, -s, s),
        "b_hh": jax.random.uniform(ks[4], (3 * hidden_size,), jnp.float32, -s, s),
        "w_dec": jax.random.uniform(ks[5], (output_size, hidden_size), jnp.float32, -s, s),
        "b_dec": jax.random.uniform(ks[6], (output_size,), jnp.float32, -s, s),
    }


if __name__ == "__main__":
    input_size = 16    # vocab size
    hidden_size = 32
    output_size = 16
    n_layers = 1       # module default; kernel implements the single-layer GRU
    batch = 2
    seq = 8

    key = jax.random.PRNGKey(0)
    kp, kt, kh = jax.random.split(key, 3)
    params = init_params(kp, input_size, hidden_size, output_size)
    tokens = jax.random.randint(kt, (batch, seq), 0, input_size, dtype=jnp.int32)

    # bf16 MXU inputs (f32 accumulation) vs a pure-f32 reference -> relaxed tol.
    TOL = dict(atol=5e-2, rtol=5e-2)

    # Case 1: init_hidden() (zeros), as the module would use.
    hidden0 = jnp.zeros((n_layers, batch, hidden_size), jnp.float32)
    out, h_final = rnn_forward(tokens, hidden0, params)
    out = jax.block_until_ready(out)
    h_final = jax.block_until_ready(h_final)
    out_ref, h_ref = rnn_forward_ref(tokens, hidden0, params)
    assert out.shape == (batch, seq, output_size)
    assert h_final.shape == (n_layers, batch, hidden_size)
    assert jnp.allclose(out, out_ref, **TOL)
    assert jnp.allclose(h_final, h_ref, **TOL)

    # Case 2: arbitrary (non-zero) incoming hidden state.
    hidden_r = jax.random.normal(kh, (n_layers, batch, hidden_size), jnp.float32)
    out2, h_final2 = rnn_forward(tokens, hidden_r, params)
    out2 = jax.block_until_ready(out2)
    h_final2 = jax.block_until_ready(h_final2)
    out_ref2, h_ref2 = rnn_forward_ref(tokens, hidden_r, params)
    assert jnp.allclose(out2, out_ref2, **TOL)
    assert jnp.allclose(h_final2, h_ref2, **TOL)

    print("KERNEL_OK")
</pallas_src>

<mosaic_0001>
module attributes {stable_mosaic.version = 11 : i64} {
  func.func @_gru_decoder_kernel(%arg0: i32, %arg1: memref<64x128xbf16, #tpu.memory_space<vmem>>, %arg2: memref<8x128xf32, #tpu.memory_space<vmem>>, %arg3: memref<128x384xbf16, #tpu.memory_space<vmem>>, %arg4: memref<128x384xbf16, #tpu.memory_space<vmem>>, %arg5: memref<1x384xf32, #tpu.memory_space<vmem>>, %arg6: memref<1x128xf32, #tpu.memory_space<vmem>>, %arg7: memref<128x128xbf16, #tpu.memory_space<vmem>>, %arg8: memref<1x128xf32, #tpu.memory_space<vmem>>, %arg9: memref<64x128xf32, #tpu.memory_space<vmem>>, %arg10: memref<8x128xf32, #tpu.memory_space<vmem>>, %arg11: memref<8x128xf32, #tpu.memory_space<vmem>>, %arg12: memref<64x384xf32, #tpu.memory_space<vmem>>, %arg13: memref<64x128xbf16, #tpu.memory_space<vmem>>) attributes {dimension_semantics = [#tpu.dimension_semantics<arbitrary>], iteration_bounds = array<i64: 1>, scalar_prefetch = 0 : i64, scratch_operands = 3 : i64, tpu.core_type = #tpu.core_type<tc>, window_params = [{transform_indices = @transform_0, window_bounds = array<i64: 64, 128>}, {pipeline_mode = #tpu.pipeline_mode<synchronous>, transform_indices = @transform_1, window_bounds = array<i64: 8, 128>}, {pipeline_mode = #tpu.pipeline_mode<synchronous>, transform_indices = @transform_2, window_bounds = array<i64: 128, 384>}, {pipeline_mode = #tpu.pipeline_mode<synchronous>, transform_indices = @transform_3, window_bounds = array<i64: 128, 384>}, {pipeline_mode = #tpu.pipeline_mode<synchronous>, transform_indices = @transform_4, window_bounds = array<i64: 1, 384>}, {pipeline_mode = #tpu.pipeline_mode<synchronous>, transform_indices = @transform_5, window_bounds = array<i64: 1, 128>}, {pipeline_mode = #tpu.pipeline_mode<synchronous>, transform_indices = @transform_6, window_bounds = array<i64: 128, 128>}, {pipeline_mode = #tpu.pipeline_mode<synchronous>, transform_indices = @transform_7, window_bounds = array<i64: 1, 128>}, {transform_indices = @transform_8, window_bounds = array<i64: 64, 128>}, {pipeline_mode = #tpu.pipeline_mode<synchronous>, transform_indices = @transform_9, window_bounds = array<i64: 8, 128>}]} {
    %c0_i32 = arith.constant 0 : i32
    %0 = arith.cmpi eq, %arg0, %c0_i32 : i32
    %1 = arith.extui %0 : i1 to i32
    %c0_i32_0 = arith.constant 0 : i32
    %2 = arith.cmpi ne, %1, %c0_i32_0 : i32
    scf.if %2 {
      %c0_120 = arith.constant 0 : index
      %c0_121 = arith.constant 0 : index
      %326 = vector.load %arg2[%c0_120, %c0_121] : memref<8x128xf32, #tpu.memory_space<vmem>>, vector<8x128xf32>
      %c0_122 = arith.constant 0 : index
      %c0_123 = arith.constant 0 : index
      %327 = vector.load %arg11[%c0_122, %c0_123] : memref<8x128xf32, #tpu.memory_space<vmem>>, vector<8x128xf32>
      tpu.vector_store %arg11[%c0_122, %c0_123], %326 {strides = array<i32>} : memref<8x128xf32, #tpu.memory_space<vmem>>, vector<8x128xf32>,
    } else {
    }
    %c0 = arith.constant 0 : index
    %c0_1 = arith.constant 0 : index
    %3 = vector.load %arg1[%c0, %c0_1] : memref<64x128xbf16, #tpu.memory_space<vmem>>, vector<64x128xbf16>
    %c0_2 = arith.constant 0 : index
    %c0_3 = arith.constant 0 : index
    %4 = vector.load %arg3[%c0_2, %c0_3] : memref<128x384xbf16, #tpu.memory_space<vmem>>, vector<128x384xbf16>
    %cst = arith.constant dense<0.000000e+00> : vector<64x384xf32>
    %5 = tpu.matmul %3, %4, %cst {dimension_numbers = #tpu.dot_dimension_numbers<[1], [0], [0], [1], [0, 0, 1, 1], [], []>} : vector<64x128xbf16>, vector<128x384xbf16>, vector<64x384xf32> -> vector<64x384xf32>
    %c0_4 = arith.constant 0 : index
    %c0_5 = arith.constant 0 : index
    %6 = vector.load %arg5[%c0_4, %c0_5] : memref<1x384xf32, #tpu.memory_space<vmem>>, vector<1x384xf32>
    %7 = vector.broadcast %6 : vector<1x384xf32> to vector<64x384xf32>
    %8 = arith.addf %5, %7 : vector<64x384xf32>
    %c0_6 = arith.constant 0 : index
    %c0_7 = arith.constant 0 : index
    %9 = vector.load %arg12[%c0_6, %c0_7] : memref<64x384xf32, #tpu.memory_space<vmem>>, vector<64x384xf32>
    tpu.vector_store %arg12[%c0_6, %c0_7], %8 {strides = array<i32>} : memref<64x384xf32, #tpu.memory_space<vmem>>, vector<64x384xf32>,
    %c0_8 = arith.constant 0 : index
    %c0_9 = arith.constant 0 : index
    %10 = vector.load %arg6[%c0_8, %c0_9] : memref<1x128xf32, #tpu.memory_space<vmem>>, vector<1x128xf32>
    %11 = vector.shape_cast %10 : vector<1x128xf32> to vector<1x128xf32>
    %12 = vector.broadcast %11 : vector<1x128xf32> to vector<8x128xf32>
    %c0_10 = arith.constant 0 : index
    %c0_11 = arith.constant 0 : index
    %13 = vector.load %arg11[%c0_10, %c0_11] : memref<8x128xf32, #tpu.memory_space<vmem>>, vector<8x128xf32>
    %c0_12 = arith.constant 0 : index
    %c0_13 = arith.constant 0 : index
    %14 = vector.load %arg12[%c0_12, %c0_13] : memref<64x384xf32, #tpu.memory_space<vmem>>, vector<8x384xf32>
    %15 = arith.truncf %13 : vector<8x128xf32> to vector<8x128xbf16>
    %c0_14 = arith.constant 0 : index
    %c0_15 = arith.constant 0 : index
    %16 = vector.load %arg4[%c0_14, %c0_15] : memref<128x384xbf16, #tpu.memory_space<vmem>>, vector<128x384xbf16>
    %cst_16 = arith.constant dense<0.000000e+00> : vector<8x384xf32>
    %17 = tpu.matmul %15, %16, %cst_16 {dimension_numbers = #tpu.dot_dimension_numbers<[1], [0], [0], [1], [0, 0, 1, 1], [], []>} : vector<8x128xbf16>, vector<128x384xbf16>, vector<8x384xf32> -> vector<8x384xf32>
    %18 = vector.extract_strided_slice %14 {offsets = [0, 0], sizes = [8, 128], strides = [1, 1]} : vector<8x384xf32> to vector<8x128xf32>
    %19 = vector.extract_strided_slice %17 {offsets = [0, 0], sizes = [8, 128], strides = [1, 1]} : vector<8x384xf32> to vector<8x128xf32>
    %20 = arith.addf %18, %19 : vector<8x128xf32>
    %21 = arith.negf %20 : vector<8x128xf32>
    %22 = math.exp %21 : vector<8x128xf32>
    %cst_17 = arith.constant 1.000000e+00 : f32
    %23 = vector.broadcast %cst_17 : f32 to vector<8x128xf32>
    %24 = arith.addf %23, %22 : vector<8x128xf32>
    %25 = arith.divf %23, %24 : vector<8x128xf32>
    %26 = vector.extract_strided_slice %14 {offsets = [0, 128], sizes = [8, 128], strides = [1, 1]} : vector<8x384xf32> to vector<8x128xf32>
    %27 = vector.extract_strided_slice %17 {offsets = [0, 128], sizes = [8, 128], strides = [1, 1]} : vector<8x384xf32> to vector<8x128xf32>
    %28 = arith.addf %26, %27 : vector<8x128xf32>
    %29 = arith.negf %28 : vector<8x128xf32>
    %30 = math.exp %29 : vector<8x128xf32>
    %cst_18 = arith.constant 1.000000e+00 : f32
    %31 = vector.broadcast %cst_18 : f32 to vector<8x128xf32>
    %32 = arith.addf %31, %30 : vector<8x128xf32>
    %33 = arith.divf %31, %32 : vector<8x128xf32>
    %34 = vector.extract_strided_slice %14 {offsets = [0, 256], sizes = [8, 128], strides = [1, 1]} : vector<8x384xf32> to vector<8x128xf32>
    %35 = vector.extract_strided_slice %17 {offsets = [0, 256], sizes = [8, 128], strides = [1, 1]} : vector<8x384xf32> to vector<8x128xf32>
    %36 = arith.addf %35, %12 : vector<8x128xf32>
    %37 = arith.mulf %25, %36 : vector<8x128xf32>
    %38 = arith.addf %34, %37 : vector<8x128xf32>
    %39 = math.tanh %38 : vector<8x128xf32>
    %cst_19 = arith.constant 1.000000e+00 : f32
    %40 = vector.broadcast %cst_19 : f32 to vector<8x128xf32>
    %41 = arith.subf %40, %33 : vector<8x128xf32>
    %42 = arith.mulf %41, %39 : vector<8x128xf32>
    %43 = arith.mulf %33, %13 : vector<8x128xf32>
    %44 = arith.addf %42, %43 : vector<8x128xf32>
    %45 = arith.truncf %44 : vector<8x128xf32> to vector<8x128xbf16>
    %c0_20 = arith.constant 0 : index
    %c0_21 = arith.constant 0 : index
    %46 = vector.load %arg13[%c0_20, %c0_21] : memref<64x128xbf16, #tpu.memory_space<vmem>>, vector<8x128xbf16>
    tpu.vector_store %arg13[%c0_20, %c0_21], %45 {strides = array<i32>} : memref<64x128xbf16, #tpu.memory_space<vmem>>, vector<8x128xbf16>,
    %c8_i32 = arith.constant 8 : i32
    %47 = arith.muli %arg0, %c8_i32 : i32
    %c0_i32_22 = arith.constant 0 : i32
    %48 = arith.addi %47, %c0_i32_22 : i32
    %c7_i32 = arith.constant 7 : i32
    %49 = arith.cmpi eq, %48, %c7_i32 : i32
    %50 = arith.extui %49 : i1 to i32
    %c0_i32_23 = arith.constant 0 : i32
    %51 = arith.cmpi ne, %50, %c0_i32_23 : i32
    scf.if %51 {
      %c0_120 = arith.constant 0 : index
      %c0_121 = arith.constant 0 : index
      %326 = vector.load %arg10[%c0_120, %c0_121] : memref<8x128xf32, #tpu.memory_space<vmem>>, vector<8x128xf32>
      tpu.vector_store %arg10[%c0_120, %c0_121], %44 {strides = array<i32>} : memref<8x128xf32, #tpu.memory_space<vmem>>, vector<8x128xf32>,
    } else {
    }
    %c8 = arith.constant 8 : index
    %c0_24 = arith.constant 0 : index
    %52 = vector.load %arg12[%c8, %c0_24] : memref<64x384xf32, #tpu.memory_space<vmem>>, vector<8x384xf32>
    %53 = arith.truncf %44 : vector<8x128xf32> to vector<8x128xbf16>
    %c0_25 = arith.constant 0 : index
    %c0_26 = arith.constant 0 : index
    %54 = vector.load %arg4[%c0_25, %c0_26] : memref<128x384xbf16, #tpu.memory_space<vmem>>, vector<128x384xbf16>
    %cst_27 = arith.constant dense<0.000000e+00> : vector<8x384xf32>
    %55 = tpu.matmul %53, %54, %cst_27 {dimension_numbers = #tpu.dot_dimension_numbers<[1], [0], [0], [1], [0, 0, 1, 1], [], []>} : vector<8x128xbf16>, vector<128x384xbf16>, vector<8x384xf32> -> vector<8x384xf32>
    %56 = vector.extract_strided_slice %52 {offsets = [0, 0], sizes = [8, 128], strides = [1, 1]} : vector<8x384xf32> to vector<8x128xf32>
    %57 = vector.extract_strided_slice %55 {offsets = [0, 0], sizes = [8, 128], strides = [1, 1]} : vector<8x384xf32> to vector<8x128xf32>
    %58 = arith.addf %56, %57 : vector<8x128xf32>
    %59 = arith.negf %58 : vector<8x128xf32>
    %60 = math.exp %59 : vector<8x128xf32>
    %cst_28 = arith.constant 1.000000e+00 : f32
    %61 = vector.broadcast %cst_28 : f32 to vector<8x128xf32>
    %62 = arith.addf %61, %60 : vector<8x128xf32>
    %63 = arith.divf %61, %62 : vector<8x128xf32>
    %64 = vector.extract_strided_slice %52 {offsets = [0, 128], sizes = [8, 128], strides = [1, 1]} : vector<8x384xf32> to vector<8x128xf32>
    %65 = vector.extract_strided_slice %55 {offsets = [0, 128], sizes = [8, 128], strides = [1, 1]} : vector<8x384xf32> to vector<8x128xf32>
    %66 = arith.addf %64, %65 : vector<8x128xf32>
    %67 = arith.negf %66 : vector<8x128xf32>
    %68 = math.exp %67 : vector<8x128xf32>
    %cst_29 = arith.constant 1.000000e+00 : f32
    %69 = vector.broadcast %cst_29 : f32 to vector<8x128xf32>
    %70 = arith.addf %69, %68 : vector<8x128xf32>
    %71 = arith.divf %69, %70 : vector<8x128xf32>
    %72 = vector.extract_strided_slice %52 {offsets = [0, 256], sizes = [8, 128], strides = [1, 1]} : vector<8x384xf32> to vector<8x128xf32>
    %73 = vector.extract_strided_slice %55 {offsets = [0, 256], sizes = [8, 128], strides = [1, 1]} : vector<8x384xf32> to vector<8x128xf32>
    %74 = arith.addf %73, %12 : vector<8x128xf32>
    %75 = arith.mulf %63, %74 : vector<8x128xf32>
    %76 = arith.addf %72, %75 : vector<8x128xf32>
    %77 = math.tanh %76 : vector<8x128xf32>
    %cst_30 = arith.constant 1.000000e+00 : f32
    %78 = vector.broadcast %cst_30 : f32 to vector<8x128xf32>
    %79 = arith.subf %78, %71 : vector<8x128xf32>
    %80 = arith.mulf %79, %77 : vector<8x128xf32>
    %81 = arith.mulf %71, %44 : vector<8x128xf32>
    %82 = arith.addf %80, %81 : vector<8x128xf32>
    %83 = arith.truncf %82 : vector<8x128xf32> to vector<8x128xbf16>
    %c8_31 = arith.constant 8 : index
    %c0_32 = arith.constant 0 : index
    %84 = vector.load %arg13[%c8_31, %c0_32] : memref<64x128xbf16, #tpu.memory_space<vmem>>, vector<8x128xbf16>
    tpu.vector_store %arg13[%c8_31, %c0_32], %83 {strides = array<i32>} : memref<64x128xbf16, #tpu.memory_space<vmem>>, vector<8x128xbf16>,
    %c8_i32_33 = arith.constant 8 : i32
    %85 = arith.muli %arg0, %c8_i32_33 : i32
    %c1_i32 = arith.constant 1 : i32
    %86 = arith.addi %85, %c1_i32 : i32
    %c7_i32_34 = arith.constant 7 : i32
    %87 = arith.cmpi eq, %86, %c7_i32_34 : i32
    %88 = arith.extui %87 : i1 to i32
    %c0_i32_35 = arith.constant 0 : i32
    %89 = arith.cmpi ne, %88, %c0_i32_35 : i32
    scf.if %89 {
      %c0_120 = arith.constant 0 : index
      %c0_121 = arith.constant 0 : index
      %326 = vector.load %arg10[%c0_120, %c0_121] : memref<8x128xf32, #tpu.memory_space<vmem>>, vector<8x128xf32>
      tpu.vector_store %arg10[%c0_120, %c0_121], %82 {strides = array<i32>} : memref<8x128xf32, #tpu.memory_space<vmem>>, vector<8x128xf32>,
    } else {
    }
    %c16 = arith.constant 16 : index
    %c0_36 = arith.constant 0 : index
    %90 = vector.load %arg12[%c16, %c0_36] : memref<64x384xf32, #tpu.memory_space<vmem>>, vector<8x384xf32>
    %91 = arith.truncf %82 : vector<8x128xf32> to vector<8x128xbf16>
    %c0_37 = arith.constant 0 : index
    %c0_38 = arith.constant 0 : index
    %92 = vector.load %arg4[%c0_37, %c0_38] : memref<128x384xbf16, #tpu.memory_space<vmem>>, vector<128x384xbf16>
    %cst_39 = arith.constant dense<0.000000e+00> : vector<8x384xf32>
    %93 = tpu.matmul %91, %92, %cst_39 {dimension_numbers = #tpu.dot_dimension_numbers<[1], [0], [0], [1], [0, 0, 1, 1], [], []>} : vector<8x128xbf16>, vector<128x384xbf16>, vector<8x384xf32> -> vector<8x384xf32>
    %94 = vector.extract_strided_slice %90 {offsets = [0, 0], sizes = [8, 128], strides = [1, 1]} : vector<8x384xf32> to vector<8x128xf32>
    %95 = vector.extract_strided_slice %93 {offsets = [0, 0], sizes = [8, 128], strides = [1, 1]} : vector<8x384xf32> to vector<8x128xf32>
    %96 = arith.addf %94, %95 : vector<8x128xf32>
    %97 = arith.negf %96 : vector<8x128xf32>
    %98 = math.exp %97 : vector<8x128xf32>
    %cst_40 = arith.constant 1.000000e+00 : f32
    %99 = vector.broadcast %cst_40 : f32 to vector<8x128xf32>
    %100 = arith.addf %99, %98 : vector<8x128xf32>
    %101 = arith.divf %99, %100 : vector<8x128xf32>
    %102 = vector.extract_strided_slice %90 {offsets = [0, 128], sizes = [8, 128], strides = [1, 1]} : vector<8x384xf32> to vector<8x128xf32>
    %103 = vector.extract_strided_slice %93 {offsets = [0, 128], sizes = [8, 128], strides = [1, 1]} : vector<8x384xf32> to vector<8x128xf32>
    %104 = arith.addf %102, %103 : vector<8x128xf32>
    %105 = arith.negf %104 : vector<8x128xf32>
    %106 = math.exp %105 : vector<8x128xf32>
    %cst_41 = arith.constant 1.000000e+00 : f32
    %107 = vector.broadcast %cst_41 : f32 to vector<8x128xf32>
    %108 = arith.addf %107, %106 : vector<8x128xf32>
    %109 = arith.divf %107, %108 : vector<8x128xf32>
    %110 = vector.extract_strided_slice %90 {offsets = [0, 256], sizes = [8, 128], strides = [1, 1]} : vector<8x384xf32> to vector<8x128xf32>
    %111 = vector.extract_strided_slice %93 {offsets = [0, 256], sizes = [8, 128], strides = [1, 1]} : vector<8x384xf32> to vector<8x128xf32>
    %112 = arith.addf %111, %12 : vector<8x128xf32>
    %113 = arith.mulf %101, %112 : vector<8x128xf32>
    %114 = arith.addf %110, %113 : vector<8x128xf32>
    %115 = math.tanh %114 : vector<8x128xf32>
    %cst_42 = arith.constant 1.000000e+00 : f32
    %116 = vector.broadcast %cst_42 : f32 to vector<8x128xf32>
    %117 = arith.subf %116, %109 : vector<8x128xf32>
    %118 = arith.mulf %117, %115 : vector<8x128xf32>
    %119 = arith.mulf %109, %82 : vector<8x128xf32>
    %120 = arith.addf %118, %119 : vector<8x128xf32>
    %121 = arith.truncf %120 : vector<8x128xf32> to vector<8x128xbf16>
    %c16_43 = arith.constant 16 : index
    %c0_44 = arith.constant 0 : index
    %122 = vector.load %arg13[%c16_43, %c0_44] : memref<64x128xbf16, #tpu.memory_space<vmem>>, vector<8x128xbf16>
    tpu.vector_store %arg13[%c16_43, %c0_44], %121 {strides = array<i32>} : memref<64x128xbf16, #tpu.memory_space<vmem>>, vector<8x128xbf16>,
    %c8_i32_45 = arith.constant 8 : i32
    %123 = arith.muli %arg0, %c8_i32_45 : i32
    %c2_i32 = arith.constant 2 : i32
    %124 = arith.addi %123, %c2_i32 : i32
    %c7_i32_46 = arith.constant 7 : i32
    %125 = arith.cmpi eq, %124, %c7_i32_46 : i32
    %126 = arith.extui %125 : i1 to i32
    %c0_i32_47 = arith.constant 0 : i32
    %127 = arith.cmpi ne, %126, %c0_i32_47 : i32
    scf.if %127 {
      %c0_120 = arith.constant 0 : index
      %c0_121 = arith.constant 0 : index
      %326 = vector.load %arg10[%c0_120, %c0_121] : memref<8x128xf32, #tpu.memory_space<vmem>>, vector<8x128xf32>
      tpu.vector_store %arg10[%c0_120, %c0_121], %120 {strides = array<i32>} : memref<8x128xf32, #tpu.memory_space<vmem>>, vector<8x128xf32>,
    } else {
    }
    %c24 = arith.constant 24 : index
    %c0_48 = arith.constant 0 : index
    %128 = vector.load %arg12[%c24, %c0_48] : memref<64x384xf32, #tpu.memory_space<vmem>>, vector<8x384xf32>
    %129 = arith.truncf %120 : vector<8x128xf32> to vector<8x128xbf16>
    %c0_49 = arith.constant 0 : index
    %c0_50 = arith.constant 0 : index
    %130 = vector.load %arg4[%c0_49, %c0_50] : memref<128x384xbf16, #tpu.memory_space<vmem>>, vector<128x384xbf16>
    %cst_51 = arith.constant dense<0.000000e+00> : vector<8x384xf32>
    %131 = tpu.matmul %129, %130, %cst_51 {dimension_numbers = #tpu.dot_dimension_numbers<[1], [0], [0], [1], [0, 0, 1, 1], [], []>} : vector<8x128xbf16>, vector<128x384xbf16>, vector<8x384xf32> -> vector<8x384xf32>
    %132 = vector.extract_strided_slice %128 {offsets = [0, 0], sizes = [8, 128], strides = [1, 1]} : vector<8x384xf32> to vector<8x128xf32>
    %133 = vector.extract_strided_slice %131 {offsets = [0, 0], sizes = [8, 128], strides = [1, 1]} : vector<8x384xf32> to vector<8x128xf32>
    %134 = arith.addf %132, %133 : vector<8x128xf32>
    %135 = arith.negf %134 : vector<8x128xf32>
    %136 = math.exp %135 : vector<8x128xf32>
    %cst_52 = arith.constant 1.000000e+00 : f32
    %137 = vector.broadcast %cst_52 : f32 to vector<8x128xf32>
    %138 = arith.addf %137, %136 : vector<8x128xf32>
    %139 = arith.divf %137, %138 : vector<8x128xf32>
    %140 = vector.extract_strided_slice %128 {offsets = [0, 128], sizes = [8, 128], strides = [1, 1]} : vector<8x384xf32> to vector<8x128xf32>
    %141 = vector.extract_strided_slice %131 {offsets = [0, 128], sizes = [8, 128], strides = [1, 1]} : vector<8x384xf32> to vector<8x128xf32>
    %142 = arith.addf %140, %141 : vector<8x128xf32>
    %143 = arith.negf %142 : vector<8x128xf32>
    %144 = math.exp %143 : vector<8x128xf32>
    %cst_53 = arith.constant 1.000000e+00 : f32
    %145 = vector.broadcast %cst_53 : f32 to vector<8x128xf32>
    %146 = arith.addf %145, %144 : vector<8x128xf32>
    %147 = arith.divf %145, %146 : vector<8x128xf32>
    %148 = vector.extract_strided_slice %128 {offsets = [0, 256], sizes = [8, 128], strides = [1, 1]} : vector<8x384xf32> to vector<8x128xf32>
    %149 = vector.extract_strided_slice %131 {offsets = [0, 256], sizes = [8, 128], strides = [1, 1]} : vector<8x384xf32> to vector<8x128xf32>
    %150 = arith.addf %149, %12 : vector<8x128xf32>
    %151 = arith.mulf %139, %150 : vector<8x128xf32>
    %152 = arith.addf %148, %151 : vector<8x128xf32>
    %153 = math.tanh %152 : vector<8x128xf32>
    %cst_54 = arith.constant 1.000000e+00 : f32
    %154 = vector.broadcast %cst_54 : f32 to vector<8x128xf32>
    %155 = arith.subf %154, %147 : vector<8x128xf32>
    %156 = arith.mulf %155, %153 : vector<8x128xf32>
    %157 = arith.mulf %147, %120 : vector<8x128xf32>
    %158 = arith.addf %156, %157 : vector<8x128xf32>
    %159 = arith.truncf %158 : vector<8x128xf32> to vector<8x128xbf16>
    %c24_55 = arith.constant 24 : index
    %c0_56 = arith.constant 0 : index
    %160 = vector.load %arg13[%c24_55, %c0_56] : memref<64x128xbf16, #tpu.memory_space<vmem>>, vector<8x128xbf16>
    tpu.vector_store %arg13[%c24_55, %c0_56], %159 {strides = array<i32>} : memref<64x128xbf16, #tpu.memory_space<vmem>>, vector<8x128xbf16>,
    %c8_i32_57 = arith.constant 8 : i32
    %161 = arith.muli %arg0, %c8_i32_57 : i32
    %c3_i32 = arith.constant 3 : i32
    %162 = arith.addi %161, %c3_i32 : i32
    %c7_i32_58 = arith.constant 7 : i32
    %163 = arith.cmpi eq, %162, %c7_i32_58 : i32
    %164 = arith.extui %163 : i1 to i32
    %c0_i32_59 = arith.constant 0 : i32
    %165 = arith.cmpi ne, %164, %c0_i32_59 : i32
    scf.if %165 {
      %c0_120 = arith.constant 0 : index
      %c0_121 = arith.constant 0 : index
      %326 = vector.load %arg10[%c0_120, %c0_121] : memref<8x128xf32, #tpu.memory_space<vmem>>, vector<8x128xf32>
      tpu.vector_store %arg10[%c0_120, %c0_121], %158 {strides = array<i32>} : memref<8x128xf32, #tpu.memory_space<vmem>>, vector<8x128xf32>,
    } else {
    }
    %c32 = arith.constant 32 : index
    %c0_60 = arith.constant 0 : index
    %166 = vector.load %arg12[%c32, %c0_60] : memref<64x384xf32, #tpu.memory_space<vmem>>, vector<8x384xf32>
    %167 = arith.truncf %158 : vector<8x128xf32> to vector<8x128xbf16>
    %c0_61 = arith.constant 0 : index
    %c0_62 = arith.constant 0 : index
    %168 = vector.load %arg4[%c0_61, %c0_62] : memref<128x384xbf16, #tpu.memory_space<vmem>>, vector<128x384xbf16>
    %cst_63 = arith.constant dense<0.000000e+00> : vector<8x384xf32>
    %169 = tpu.matmul %167, %168, %cst_63 {dimension_numbers = #tpu.dot_dimension_numbers<[1], [0], [0], [1], [0, 0, 1, 1], [], []>} : vector<8x128xbf16>, vector<128x384xbf16>, vector<8x384xf32> -> vector<8x384xf32>
    %170 = vector.extract_strided_slice %166 {offsets = [0, 0], sizes = [8, 128], strides = [1, 1]} : vector<8x384xf32> to vector<8x128xf32>
    %171 = vector.extract_strided_slice %169 {offsets = [0, 0], sizes = [8, 128], strides = [1, 1]} : vector<8x384xf32> to vector<8x128xf32>
    %172 = arith.addf %170, %171 : vector<8x128xf32>
    %173 = arith.negf %172 : vector<8x128xf32>
    %174 = math.exp %173 : vector<8x128xf32>
    %cst_64 = arith.constant 1.000000e+00 : f32
    %175 = vector.broadcast %cst_64 : f32 to vector<8x128xf32>
    %176 = arith.addf %175, %174 : vector<8x128xf32>
    %177 = arith.divf %175, %176 : vector<8x128xf32>
    %178 = vector.extract_strided_slice %166 {offsets = [0, 128], sizes = [8, 128], strides = [1, 1]} : vector<8x384xf32> to vector<8x128xf32>
    %179 = vector.extract_strided_slice %169 {offsets = [0, 128], sizes = [8, 128], strides = [1, 1]} : vector<8x384xf32> to vector<8x128xf32>
    %180 = arith.addf %178, %179 : vector<8x128xf32>
    %181 = arith.negf %180 : vector<8x128xf32>
    %182 = math.exp %181 : vector<8x128xf32>
    %cst_65 = arith.constant 1.000000e+00 : f32
    %183 = vector.broadcast %cst_65 : f32 to vector<8x128xf32>
    %184 = arith.addf %183, %182 : vector<8x128xf32>
    %185 = arith.divf %183, %184 : vector<8x128xf32>
    %186 = vector.extract_strided_slice %166 {offsets = [0, 256], sizes = [8, 128], strides = [1, 1]} : vector<8x384xf32> to vector<8x128xf32>
    %187 = vector.extract_strided_slice %169 {offsets = [0, 256], sizes = [8, 128], strides = [1, 1]} : vector<8x384xf32> to vector<8x128xf32>
    %188 = arith.addf %187, %12 : vector<8x128xf32>
    %189 = arith.mulf %177, %188 : vector<8x128xf32>
    %190 = arith.addf %186, %189 : vector<8x128xf32>
    %191 = math.tanh %190 : vector<8x128xf32>
    %cst_66 = arith.constant 1.000000e+00 : f32
    %192 = vector.broadcast %cst_66 : f32 to vector<8x128xf32>
    %193 = arith.subf %192, %185 : vector<8x128xf32>
    %194 = arith.mulf %193, %191 : vector<8x128xf32>
    %195 = arith.mulf %185, %158 : vector<8x128xf32>
    %196 = arith.addf %194, %195 : vector<8x128xf32>
    %197 = arith.truncf %196 : vector<8x128xf32> to vector<8x128xbf16>
    %c32_67 = arith.constant 32 : index
    %c0_68 = arith.constant 0 : index
    %198 = vector.load %arg13[%c32_67, %c0_68] : memref<64x128xbf16, #tpu.memory_space<vmem>>, vector<8x128xbf16>
    tpu.vector_store %arg13[%c32_67, %c0_68], %197 {strides = array<i32>} : memref<64x128xbf16, #tpu.memory_space<vmem>>, vector<8x128xbf16>,
    %c8_i32_69 = arith.constant 8 : i32
    %199 = arith.muli %arg0, %c8_i32_69 : i32
    %c4_i32 = arith.constant 4 : i32
    %200 = arith.addi %199, %c4_i32 : i32
    %c7_i32_70 = arith.constant 7 : i32
    %201 = arith.cmpi eq, %200, %c7_i32_70 : i32
    %202 = arith.extui %201 : i1 to i32
    %c0_i32_71 = arith.constant 0 : i32
    %203 = arith.cmpi ne, %202, %c0_i32_71 : i32
    scf.if %203 {
      %c0_120 = arith.constant 0 : index
      %c0_121 = arith.constant 0 : index
      %326 = vector.load %arg10[%c0_120, %c0_121] : memref<8x128xf32, #tpu.memory_space<vmem>>, vector<8x128xf32>
      tpu.vector_store %arg10[%c0_120, %c0_121], %196 {strides = array<i32>} : memref<8x128xf32, #tpu.memory_space<vmem>>, vector<8x128xf32>,
    } else {
    }
    %c40 = arith.constant 40 : index
    %c0_72 = arith.constant 0 : index
    %204 = vector.load %arg12[%c40, %c0_72] : memref<64x384xf32, #tpu.memory_space<vmem>>, vector<8x384xf32>
    %205 = arith.truncf %196 : vector<8x128xf32> to vector<8x128xbf16>
    %c0_73 = arith.constant 0 : index
    %c0_74 = arith.constant 0 : index
    %206 = vector.load %arg4[%c0_73, %c0_74] : memref<128x384xbf16, #tpu.memory_space<vmem>>, vector<128x384xbf16>
    %cst_75 = arith.constant dense<0.000000e+00> : vector<8x384xf32>
    %207 = tpu.matmul %205, %206, %cst_75 {dimension_numbers = #tpu.dot_dimension_numbers<[1], [0], [0], [1], [0, 0, 1, 1], [], []>} : vector<8x128xbf16>, vector<128x384xbf16>, vector<8x384xf32> -> vector<8x384xf32>
    %208 = vector.extract_strided_slice %204 {offsets = [0, 0], sizes = [8, 128], strides = [1, 1]} : vector<8x384xf32> to vector<8x128xf32>
    %209 = vector.extract_strided_slice %207 {offsets = [0, 0], sizes = [8, 128], strides = [1, 1]} : vector<8x384xf32> to vector<8x128xf32>
    %210 = arith.addf %208, %209 : vector<8x128xf32>
    %211 = arith.negf %210 : vector<8x128xf32>
    %212 = math.exp %211 : vector<8x128xf32>
    %cst_76 = arith.constant 1.000000e+00 : f32
    %213 = vector.broadcast %cst_76 : f32 to vector<8x128xf32>
    %214 = arith.addf %213, %212 : vector<8x128xf32>
    %215 = arith.divf %213, %214 : vector<8x128xf32>
    %216 = vector.extract_strided_slice %204 {offsets = [0, 128], sizes = [8, 128], strides = [1, 1]} : vector<8x384xf32> to vector<8x128xf32>
    %217 = vector.extract_strided_slice %207 {offsets = [0, 128], sizes = [8, 128], strides = [1, 1]} : vector<8x384xf32> to vector<8x128xf32>
    %218 = arith.addf %216, %217 : vector<8x128xf32>
    %219 = arith.negf %218 : vector<8x128xf32>
    %220 = math.exp %219 : vector<8x128xf32>
    %cst_77 = arith.constant 1.000000e+00 : f32
    %221 = vector.broadcast %cst_77 : f32 to vector<8x128xf32>
    %222 = arith.addf %221, %220 : vector<8x128xf32>
    %223 = arith.divf %221, %222 : vector<8x128xf32>
    %224 = vector.extract_strided_slice %204 {offsets = [0, 256], sizes = [8, 128], strides = [1, 1]} : vector<8x384xf32> to vector<8x128xf32>
    %225 = vector.extract_strided_slice %207 {offsets = [0, 256], sizes = [8, 128], strides = [1, 1]} : vector<8x384xf32> to vector<8x128xf32>
    %226 = arith.addf %225, %12 : vector<8x128xf32>
    %227 = arith.mulf %215, %226 : vector<8x128xf32>
    %228 = arith.addf %224, %227 : vector<8x128xf32>
    %229 = math.tanh %228 : vector<8x128xf32>
    %cst_78 = arith.constant 1.000000e+00 : f32
    %230 = vector.broadcast %cst_78 : f32 to vector<8x128xf32>
    %231 = arith.subf %230, %223 : vector<8x128xf32>
    %232 = arith.mulf %231, %229 : vector<8x128xf32>
    %233 = arith.mulf %223, %196 : vector<8x128xf32>
    %234 = arith.addf %232, %233 : vector<8x128xf32>
    %235 = arith.truncf %234 : vector<8x128xf32> to vector<8x128xbf16>
    %c40_79 = arith.constant 40 : index
    %c0_80 = arith.constant 0 : index
    %236 = vector.load %arg13[%c40_79, %c0_80] : memref<64x128xbf16, #tpu.memory_space<vmem>>, vector<8x128xbf16>
    tpu.vector_store %arg13[%c40_79, %c0_80], %235 {strides = array<i32>} : memref<64x128xbf16, #tpu.memory_space<vmem>>, vector<8x128xbf16>,
    %c8_i32_81 = arith.constant 8 : i32
    %237 = arith.muli %arg0, %c8_i32_81 : i32
    %c5_i32 = arith.constant 5 : i32
    %238 = arith.addi %237, %c5_i32 : i32
    %c7_i32_82 = arith.constant 7 : i32
    %239 = arith.cmpi eq, %238, %c7_i32_82 : i32
    %240 = arith.extui %239 : i1 to i32
    %c0_i32_83 = arith.constant 0 : i32
    %241 = arith.cmpi ne, %240, %c0_i32_83 : i32
    scf.if %241 {
      %c0_120 = arith.constant 0 : index
      %c0_121 = arith.constant 0 : index
      %326 = vector.load %arg10[%c0_120, %c0_121] : memref<8x128xf32, #tpu.memory_space<vmem>>, vector<8x128xf32>
      tpu.vector_store %arg10[%c0_120, %c0_121], %234 {strides = array<i32>} : memref<8x128xf32, #tpu.memory_space<vmem>>, vector<8x128xf32>,
    } else {
    }
    %c48 = arith.constant 48 : index
    %c0_84 = arith.constant 0 : index
    %242 = vector.load %arg12[%c48, %c0_84] : memref<64x384xf32, #tpu.memory_space<vmem>>, vector<8x384xf32>
    %243 = arith.truncf %234 : vector<8x128xf32> to vector<8x128xbf16>
    %c0_85 = arith.constant 0 : index
    %c0_86 = arith.constant 0 : index
    %244 = vector.load %arg4[%c0_85, %c0_86] : memref<128x384xbf16, #tpu.memory_space<vmem>>, vector<128x384xbf16>
    %cst_87 = arith.constant dense<0.000000e+00> : vector<8x384xf32>
    %245 = tpu.matmul %243, %244, %cst_87 {dimension_numbers = #tpu.dot_dimension_numbers<[1], [0], [0], [1], [0, 0, 1, 1], [], []>} : vector<8x128xbf16>, vector<128x384xbf16>, vector<8x384xf32> -> vector<8x384xf32>
    %246 = vector.extract_strided_slice %242 {offsets = [0, 0], sizes = [8, 128], strides = [1, 1]} : vector<8x384xf32> to vector<8x128xf32>
    %247 = vector.extract_strided_slice %245 {offsets = [0, 0], sizes = [8, 128], strides = [1, 1]} : vector<8x384xf32> to vector<8x128xf32>
    %248 = arith.addf %246, %247 : vector<8x128xf32>
    %249 = arith.negf %248 : vector<8x128xf32>
    %250 = math.exp %249 : vector<8x128xf32>
    %cst_88 = arith.constant 1.000000e+00 : f32
    %251 = vector.broadcast %cst_88 : f32 to vector<8x128xf32>
    %252 = arith.addf %251, %250 : vector<8x128xf32>
    %253 = arith.divf %251, %252 : vector<8x128xf32>
    %254 = vector.extract_strided_slice %242 {offsets = [0, 128], sizes = [8, 128], strides = [1, 1]} : vector<8x384xf32> to vector<8x128xf32>
    %255 = vector.extract_strided_slice %245 {offsets = [0, 128], sizes = [8, 128], strides = [1, 1]} : vector<8x384xf32> to vector<8x128xf32>
    %256 = arith.addf %254, %255 : vector<8x128xf32>
    %257 = arith.negf %256 : vector<8x128xf32>
    %258 = math.exp %257 : vector<8x128xf32>
    %cst_89 = arith.constant 1.000000e+00 : f32
    %259 = vector.broadcast %cst_89 : f32 to vector<8x128xf32>
    %260 = arith.addf %259, %258 : vector<8x128xf32>
    %261 = arith.divf %259, %260 : vector<8x128xf32>
    %262 = vector.extract_strided_slice %242 {offsets = [0, 256], sizes = [8, 128], strides = [1, 1]} : vector<8x384xf32> to vector<8x128xf32>
    %263 = vector.extract_strided_slice %245 {offsets = [0, 256], sizes = [8, 128], strides = [1, 1]} : vector<8x384xf32> to vector<8x128xf32>
    %264 = arith.addf %263, %12 : vector<8x128xf32>
    %265 = arith.mulf %253, %264 : vector<8x128xf32>
    %266 = arith.addf %262, %265 : vector<8x128xf32>
    %267 = math.tanh %266 : vector<8x128xf32>
    %cst_90 = arith.constant 1.000000e+00 : f32
    %268 = vector.broadcast %cst_90 : f32 to vector<8x128xf32>
    %269 = arith.subf %268, %261 : vector<8x128xf32>
    %270 = arith.mulf %269, %267 : vector<8x128xf32>
    %271 = arith.mulf %261, %234 : vector<8x128xf32>
    %272 = arith.addf %270, %271 : vector<8x128xf32>
    %273 = arith.truncf %272 : vector<8x128xf32> to vector<8x128xbf16>
    %c48_91 = arith.constant 48 : index
    %c0_92 = arith.constant 0 : index
    %274 = vector.load %arg13[%c48_91, %c0_92] : memref<64x128xbf16, #tpu.memory_space<vmem>>, vector<8x128xbf16>
    tpu.vector_store %arg13[%c48_91, %c0_92], %273 {strides = array<i32>} : memref<64x128xbf16, #tpu.memory_space<vmem>>, vector<8x128xbf16>,
    %c8_i32_93 = arith.constant 8 : i32
    %275 = arith.muli %arg0, %c8_i32_93 : i32
    %c6_i32 = arith.constant 6 : i32
    %276 = arith.addi %275, %c6_i32 : i32
    %c7_i32_94 = arith.constant 7 : i32
    %277 = arith.cmpi eq, %276, %c7_i32_94 : i32
    %278 = arith.extui %277 : i1 to i32
    %c0_i32_95 = arith.constant 0 : i32
    %279 = arith.cmpi ne, %278, %c0_i32_95 : i32
    scf.if %279 {
      %c0_120 = arith.constant 0 : index
      %c0_121 = arith.constant 0 : index
      %326 = vector.load %arg10[%c0_120, %c0_121] : memref<8x128xf32, #tpu.memory_space<vmem>>, vector<8x128xf32>
      tpu.vector_store %arg10[%c0_120, %c0_121], %272 {strides = array<i32>} : memref<8x128xf32, #tpu.memory_space<vmem>>, vector<8x128xf32>,
    } else {
    }
    %c56 = arith.constant 56 : index
    %c0_96 = arith.constant 0 : index
    %280 = vector.load %arg12[%c56, %c0_96] : memref<64x384xf32, #tpu.memory_space<vmem>>, vector<8x384xf32>
    %281 = arith.truncf %272 : vector<8x128xf32> to vector<8x128xbf16>
    %c0_97 = arith.constant 0 : index
    %c0_98 = arith.constant 0 : index
    %282 = vector.load %arg4[%c0_97, %c0_98] : memref<128x384xbf16, #tpu.memory_space<vmem>>, vector<128x384xbf16>
    %cst_99 = arith.constant dense<0.000000e+00> : vector<8x384xf32>
    %283 = tpu.matmul %281, %282, %cst_99 {dimension_numbers = #tpu.dot_dimension_numbers<[1], [0], [0], [1], [0, 0, 1, 1], [], []>} : vector<8x128xbf16>, vector<128x384xbf16>, vector<8x384xf32> -> vector<8x384xf32>
    %284 = vector.extract_strided_slice %280 {offsets = [0, 0], sizes = [8, 128], strides = [1, 1]} : vector<8x384xf32> to vector<8x128xf32>
    %285 = vector.extract_strided_slice %283 {offsets = [0, 0], sizes = [8, 128], strides = [1, 1]} : vector<8x384xf32> to vector<8x128xf32>
    %286 = arith.addf %284, %285 : vector<8x128xf32>
    %287 = arith.negf %286 : vector<8x128xf32>
    %288 = math.exp %287 : vector<8x128xf32>
    %cst_100 = arith.constant 1.000000e+00 : f32
    %289 = vector.broadcast %cst_100 : f32 to vector<8x128xf32>
    %290 = arith.addf %289, %288 : vector<8x128xf32>
    %291 = arith.divf %289, %290 : vector<8x128xf32>
    %292 = vector.extract_strided_slice %280 {offsets = [0, 128], sizes = [8, 128], strides = [1, 1]} : vector<8x384xf32> to vector<8x128xf32>
    %293 = vector.extract_strided_slice %283 {offsets = [0, 128], sizes = [8, 128], strides = [1, 1]} : vector<8x384xf32> to vector<8x128xf32>
    %294 = arith.addf %292, %293 : vector<8x128xf32>
    %295 = arith.negf %294 : vector<8x128xf32>
    %296 = math.exp %295 : vector<8x128xf32>
    %cst_101 = arith.constant 1.000000e+00 : f32
    %297 = vector.broadcast %cst_101 : f32 to vector<8x128xf32>
    %298 = arith.addf %297, %296 : vector<8x128xf32>
    %299 = arith.divf %297, %298 : vector<8x128xf32>
    %300 = vector.extract_strided_slice %280 {offsets = [0, 256], sizes = [8, 128], strides = [1, 1]} : vector<8x384xf32> to vector<8x128xf32>
    %301 = vector.extract_strided_slice %283 {offsets = [0, 256], sizes = [8, 128], strides = [1, 1]} : vector<8x384xf32> to vector<8x128xf32>
    %302 = arith.addf %301, %12 : vector<8x128xf32>
    %303 = arith.mulf %291, %302 : vector<8x128xf32>
    %304 = arith.addf %300, %303 : vector<8x128xf32>
    %305 = math.tanh %304 : vector<8x128xf32>
    %cst_102 = arith.constant 1.000000e+00 : f32
    %306 = vector.broadcast %cst_102 : f32 to vector<8x128xf32>
    %307 = arith.subf %306, %299 : vector<8x128xf32>
    %308 = arith.mulf %307, %305 : vector<8x128xf32>
    %309 = arith.mulf %299, %272 : vector<8x128xf32>
    %310 = arith.addf %308, %309 : vector<8x128xf32>
    %311 = arith.truncf %310 : vector<8x128xf32> to vector<8x128xbf16>
    %c56_103 = arith.constant 56 : index
    %c0_104 = arith.constant 0 : index
    %312 = vector.load %arg13[%c56_103, %c0_104] : memref<64x128xbf16, #tpu.memory_space<vmem>>, vector<8x128xbf16>
    tpu.vector_store %arg13[%c56_103, %c0_104], %311 {strides = array<i32>} : memref<64x128xbf16, #tpu.memory_space<vmem>>, vector<8x128xbf16>,
    %c8_i32_105 = arith.constant 8 : i32
    %313 = arith.muli %arg0, %c8_i32_105 : i32
    %c7_i32_106 = arith.constant 7 : i32
    %314 = arith.addi %313, %c7_i32_106 : i32
    %c7_i32_107 = arith.constant 7 : i32
    %315 = arith.cmpi eq, %314, %c7_i32_107 : i32
    %316 = arith.extui %315 : i1 to i32
    %c0_i32_108 = arith.constant 0 : i32
    %317 = arith.cmpi ne, %316, %c0_i32_108 : i32
    scf.if %317 {
      %c0_120 = arith.constant 0 : index
      %c0_121 = arith.constant 0 : index
      %326 = vector.load %arg10[%c0_120, %c0_121] : memref<8x128xf32, #tpu.memory_space<vmem>>, vector<8x128xf32>
      tpu.vector_store %arg10[%c0_120, %c0_121], %310 {strides = array<i32>} : memref<8x128xf32, #tpu.memory_space<vmem>>, vector<8x128xf32>,
    } else {
    }
    %c0_109 = arith.constant 0 : index
    %c0_110 = arith.constant 0 : index
    %318 = vector.load %arg11[%c0_109, %c0_110] : memref<8x128xf32, #tpu.memory_space<vmem>>, vector<8x128xf32>
    tpu.vector_store %arg11[%c0_109, %c0_110], %310 {strides = array<i32>} : memref<8x128xf32, #tpu.memory_space<vmem>>, vector<8x128xf32>,
    %c0_111 = arith.constant 0 : index
    %c0_112 = arith.constant 0 : index
    %319 = vector.load %arg13[%c0_111, %c0_112] : memref<64x128xbf16, #tpu.memory_space<vmem>>, vector<64x128xbf16>
    %c0_113 = arith.constant 0 : index
    %c0_114 = arith.constant 0 : index
    %320 = vector.load %arg7[%c0_113, %c0_114] : memref<128x128xbf16, #tpu.memory_space<vmem>>, vector<128x128xbf16>
    %cst_115 = arith.constant dense<0.000000e+00> : vector<64x128xf32>
    %321 = tpu.matmul %319, %320, %cst_115 {dimension_numbers = #tpu.dot_dimension_numbers<[1], [0], [0], [1], [0, 0, 1, 1], [], []>} : vector<64x128xbf16>, vector<128x128xbf16>, vector<64x128xf32> -> vector<64x128xf32>
    %c0_116 = arith.constant 0 : index
    %c0_117 = arith.constant 0 : index
    %322 = vector.load %arg8[%c0_116, %c0_117] : memref<1x128xf32, #tpu.memory_space<vmem>>, vector<1x128xf32>
    %323 = vector.broadcast %322 : vector<1x128xf32> to vector<64x128xf32>
    %324 = arith.addf %321, %323 : vector<64x128xf32>
    %c0_118 = arith.constant 0 : index
    %c0_119 = arith.constant 0 : index
    %325 = vector.load %arg9[%c0_118, %c0_119] : memref<64x128xf32, #tpu.memory_space<vmem>>, vector<64x128xf32>
    tpu.vector_store %arg9[%c0_118, %c0_119], %324 {strides = array<i32>} : memref<64x128xf32, #tpu.memory_space<vmem>>, vector<64x128xf32>,
    return
  }
  func.func @transform_0(%arg0: i32) -> (i32, i32) {
    %c0_i32 = arith.constant 0 : i32
    %c0_i32_0 = arith.constant 0 : i32
    return %arg0, %c0_i32 : i32, i32
  }
  func.func @transform_1(%arg0: i32) -> (i32, i32) {
    %c0_i32 = arith.constant 0 : i32
    %c0_i32_0 = arith.constant 0 : i32
    %c0_i32_1 = arith.constant 0 : i32
    return %c0_i32, %c0_i32_0 : i32, i32
  }
  func.func @transform_2(%arg0: i32) -> (i32, i32) {
    %c0_i32 = arith.constant 0 : i32
    %c0_i32_0 = arith.constant 0 : i32
    %c0_i32_1 = arith.constant 0 : i32
    return %c0_i32, %c0_i32_0 : i32, i32
  }
  func.func @transform_3(%arg0: i32) -> (i32, i32) {
    %c0_i32 = arith.constant 0 : i32
    %c0_i32_0 = arith.constant 0 : i32
    %c0_i32_1 = arith.constant 0 : i32
    return %c0_i32, %c0_i32_0 : i32, i32
  }
  func.func @transform_4(%arg0: i32) -> (i32, i32) {
    %c0_i32 = arith.constant 0 : i32
    %c0_i32_0 = arith.constant 0 : i32
    %c0_i32_1 = arith.constant 0 : i32
    return %c0_i32, %c0_i32_0 : i32, i32
  }
  func.func @transform_5(%arg0: i32) -> (i32, i32) {
    %c0_i32 = arith.constant 0 : i32
    %c0_i32_0 = arith.constant 0 : i32
    %c0_i32_1 = arith.constant 0 : i32
    return %c0_i32, %c0_i32_0 : i32, i32
  }
  func.func @transform_6(%arg0: i32) -> (i32, i32) {
    %c0_i32 = arith.constant 0 : i32
    %c0_i32_0 = arith.constant 0 : i32
    %c0_i32_1 = arith.constant 0 : i32
    return %c0_i32, %c0_i32_0 : i32, i32
  }
  func.func @transform_7(%arg0: i32) -> (i32, i32) {
    %c0_i32 = arith.constant 0 : i32
    %c0_i32_0 = arith.constant 0 : i32
    %c0_i32_1 = arith.constant 0 : i32
    return %c0_i32, %c0_i32_0 : i32, i32
  }
  func.func @transform_8(%arg0: i32) -> (i32, i32) {
    %c0_i32 = arith.constant 0 : i32
    %c0_i32_0 = arith.constant 0 : i32
    return %arg0, %c0_i32 : i32, i32
  }
  func.func @transform_9(%arg0: i32) -> (i32, i32) {
    %c0_i32 = arith.constant 0 : i32
    %c0_i32_0 = arith.constant 0 : i32
    %c0_i32_1 = arith.constant 0 : i32
    return %c0_i32, %c0_i32_0 : i32, i32
  }
}

</mosaic_0001>

<bundles_post_ra>
// kernel: rnn_forward.1
= control target key start
LH: loop header
LB: loop body
LE: loop exit
PB: predicated region body
PF: predicated region fallthrough
CT: control target
= control target key end

     0   :  { %v3593_v1 = vmov 0   ;;  %v3594_v48 = vmov 0.0   ;;  %vm3595_vm0 = vmmov 0   ;;  %s4484_s2 = inlined_call_operand.vmem [shape: bf16[128,384], index: 2, kind: input, shape index: {}]   ;;  %s4485_s3 = inlined_call_operand.vmem [shape: bf16[128,384], index: 3, kind: input, shape index: {}]   ;;  %s4486_s0 = inlined_call_operand.vmem [shape: bf16[64,128], index: 0, kind: input, shape index: {}]   ;;  %s4487_s1 = inlined_call_operand.vmem [shape: f32[8,128], index: 1, kind: input, shape index: {}]   ;;  %s4488_s4 = inlined_call_operand.vmem [shape: f32[1,384], index: 4, kind: input, shape index: {}]   ;;  %s4489_s5 = inlined_call_operand.vmem [shape: f32[1,128], index: 5, kind: input, shape index: {}]   ;;  %s4490_s6 = inlined_call_operand.vmem [shape: bf16[128,128], index: 6, kind: input, shape index: {}]   ;;  %s4491_s7 = inlined_call_operand.vmem [shape: f32[1,128], index: 7, kind: input, shape index: {}]   ;;  %s4492_s8 = inlined_call_operand.vmem [shape: f32[64,128], index: 8, kind: output, shape index: {0}]   ;;  %s4493_s9 = inlined_call_operand.vmem [shape: f32[8,128], index: 9, kind: output, shape index: {1}]  }
   0x1   :  { %v3352_v0 = vld [vmem:[%s4484_s2 + $0xac] ss:$12 sps:$4 sm:$0xff]   ;;  %279 = vmatprep.mubr.bf16.mxu1 %v3593_v1  ;;  %613 = vmatprep.mubr.bf16.mxu0 %v3593_v1  ;;  %v3354_v2 = vld [vmem:[%s4484_s2 + $0xa8] ss:$12 sps:$4 sm:$0xff]   ;;  %v3360_v6 = vld [vmem:[%s4484_s2 + $0x90] ss:$12 sps:$4 sm:$0xff]  }
   0x2   :  { %247 = vmatprep.subr.bf16.mxu1 %v3352_v0  ;;  %v3657_v3 = vld [vmem:[%s4485_s3 + $0xac] ss:$12 sps:$4 sm:$0xff]   ;;  %v3662_v4 = vld [vmem:[%s4485_s3 + $0xa8] ss:$12 sps:$4 sm:$0xff]   ;;  %v3680_v8 = vld [vmem:[%s4485_s3 + $0x90] ss:$12 sps:$4 sm:$0xff]   ;;  %v80_v0 = vlaneseq }
   0x3   :  { %248 = vmatpush1.bf16.msra.mxu1 %v3354_v2  ;;  %v3358_v5 = vld [vmem:[%s4484_s2 + $0x94] ss:$12 sps:$4 sm:$0xff]   ;;  %581 = vmatprep.subr.bf16.mxu0 %v3657_v3  ;;  %v3364_v9 = vld [vmem:[%s4484_s2 + $0x7c] ss:$12 sps:$4 sm:$0xff]   ;;  %v3366_v10 = vld [vmem:[%s4484_s2 + $0x78] ss:$12 sps:$4 sm:$0xff]  }
   0x4   :  { %v3674_v7 = vld [vmem:[%s4485_s3 + $0x94] ss:$12 sps:$4 sm:$0xff]   ;;  %582 = vmatpush1.bf16.msra.mxu0 %v3662_v4  ;;  %249 = vmatprep.subr.bf16.mxu1 %v3358_v5  ;;  %v3692_v11 = vld [vmem:[%s4485_s3 + $0x7c] ss:$12 sps:$4 sm:$0xff]   ;;  %v3370_v12 = vld [vmem:[%s4484_s2 + $0x64] ss:$12 sps:$4 sm:$0xff]  }
   0x5   :  { %583 = vmatprep.subr.bf16.mxu0 %v3674_v7  ;;  %v3701_v13 = vld [vmem:[%s4485_s3 + $0x78] ss:$12 sps:$4 sm:$0xff]   ;;  %v3372_v15 = vld [vmem:[%s4484_s2 + $0x60] ss:$12 sps:$4 sm:$0xff]   ;;  %v3378_v19 = vld [vmem:[%s4484_s2 + $0x48] ss:$12 sps:$4 sm:$0xff]  }
   0x6   :  { %v3707_v14 = vld [vmem:[%s4485_s3 + $0x64] ss:$12 sps:$4 sm:$0xff]   ;;  %v3376_v16 = vld [vmem:[%s4484_s2 + $0x4c] ss:$12 sps:$4 sm:$0xff]   ;;  %v3382_v20 = vld [vmem:[%s4484_s2 + $0x34] ss:$12 sps:$4 sm:$0xff]  }
   0x7   :  { %250 = vmatpush1.bf16.msra.mxu1 %v3360_v6  ;;  %v3719_v17 = vld [vmem:[%s4485_s3 + $0x60] ss:$12 sps:$4 sm:$0xff]   ;;  %v3737_v21 = vld [vmem:[%s4485_s3 + $0x48] ss:$12 sps:$4 sm:$0xff]   ;;  %v3384_v23 = vld [vmem:[%s4484_s2 + $0x30] ss:$12 sps:$4 sm:$0xff]  }
   0x8   :  { %251 = vmatprep.subr.bf16.mxu1 %v3364_v9  ;;  %584 = vmatpush1.bf16.msra.mxu0 %v3680_v8  ;;  %v3725_v18 = vld [vmem:[%s4485_s3 + $0x4c] ss:$12 sps:$4 sm:$0xff]   ;;  %v3743_v22 = vld [vmem:[%s4485_s3 + $0x34] ss:$12 sps:$4 sm:$0xff]   ;;  %v3388_v24 = vld [vmem:[%s4484_s2 + $0x1c] ss:$12 sps:$4 sm:$0xff]  }
   0x9   :  { %585 = vmatprep.subr.bf16.mxu0 %v3692_v11  ;;  %v3755_v25 = vld [vmem:[%s4485_s3 + $0x30] ss:$12 sps:$4 sm:$0xff]   ;;  %v3390_v27 = vld [vmem:[%s4484_s2 + $0x18] ss:$12 sps:$4 sm:$0xff]   ;;  %v3396_v30 = vld [vmem:[%s4484_s2] ss:$12 sps:$4 sm:$0xff]  }
   0xa   :  { %v3761_v26 = vld [vmem:[%s4485_s3 + $0x1c] ss:$12 sps:$4 sm:$0xff]   ;;  %v3769_v28 = vld [vmem:[%s4485_s3 + $0x18] ss:$12 sps:$4 sm:$0xff]   ;;  %v3787_v32 = vld [vmem:[%s4485_s3] ss:$12 sps:$4 sm:$0xff]  }
   0xb   :  { %252 = vmatpush1.bf16.msra.mxu1 %v3366_v10  ;;  %v3394_v29 = vld [vmem:[%s4484_s2 + $0x4] ss:$12 sps:$4 sm:$0xff]   ;;  %v3404_v38 = vld [vmem:[%s4484_s2 + $0x80] ss:$12 sps:$4 sm:$0xff]   ;;  %v3405_v40 = vld [vmem:[%s4484_s2 + $0x68] ss:$12 sps:$4 sm:$0xff]  }
   0xc   :  { %253 = vmatprep.subr.bf16.mxu1 %v3370_v12  ;;  %586 = vmatpush1.bf16.msra.mxu0 %v3701_v13  ;;  %v3782_v31 = vld [vmem:[%s4485_s3 + $0x4] ss:$12 sps:$4 sm:$0xff]   ;;  %v3403_v39 = vld [vmem:[%s4486_s0 + $0x8] sm:$0xff]   ;;  %v3409_v45 = vld [vmem:[%s4486_s0 + $0x18] sm:$0xff]   ;;  %v81_v2 = vshrl.u32 %v80_v0, 7 }
   0xd   :  { %587 = vmatprep.subr.bf16.mxu0 %v3707_v14  ;;  %v3401_v33 = vld [vmem:[%s4484_s2 + $0xb0] ss:$12 sps:$4 sm:$0xff]   ;;  %v3796_v34 = vld [vmem:[%s4487_s1] sm:$0xff]  ;;  %v3411_v46 = vld [vmem:[%s4484_s2 + $0x8] ss:$12 sps:$4 sm:$0xff]  }
   0xe   :  { %v3400_v35 = vld [vmem:[%s4486_s0] sm:$0xff]   ;;  %v3804_v36 = vpack.c.bf16 %v3796_v34, %v3796_v34  ;;  %v3407_v41 = vld [vmem:[%s4484_s2 + $0x50] ss:$12 sps:$4 sm:$0xff]   ;;  %v3415_v51 = vld [vmem:[%s4485_s3 + $0x68] ss:$12 sps:$4 sm:$0xff]   ;;  %v86_v9 = vsub.s32 1, %v81_v2 }
   0xf   :  { %254 = vmatpush1.bf16.msra.mxu1 %v3372_v15  ;;  %v3402_v37 = vld [vmem:[%s4484_s2 + $0x98] ss:$12 sps:$4 sm:$0xff]   ;;  %v3406_v42 = vld [vmem:[%s4486_s0 + $0x10] sm:$0xff]   ;;  %v3410_v44 = vld [vmem:[%s4484_s2 + $0x20] ss:$12 sps:$4 sm:$0xff]  }
  0x10   :  { %255 = vmatprep.subr.bf16.mxu1 %v3376_v16  ;;  %588 = vmatpush1.bf16.msra.mxu0 %v3719_v17  ;;  %v3408_v43 = vld [vmem:[%s4484_s2 + $0x38] ss:$12 sps:$4 sm:$0xff]   ;;  %v3412_v47 = vld [vmem:[%s4485_s3 + $0xb0] ss:$12 sps:$4 sm:$0xff]   ;;  %v3414_v50 = vld [vmem:[%s4485_s3 + $0x80] ss:$12 sps:$4 sm:$0xff]  }
  0x11   :  { %589 = vmatprep.subr.bf16.mxu0 %v3725_v18  ;;  %v3413_v49 = vld [vmem:[%s4485_s3 + $0x98] ss:$12 sps:$4 sm:$0xff]   ;;  %v3416_v52 = vld [vmem:[%s4485_s3 + $0x50] ss:$12 sps:$4 sm:$0xff]   ;;  %v3418_v54 = vld [vmem:[%s4485_s3 + $0x20] ss:$12 sps:$4 sm:$0xff]  }
  0x12   :  { %v3417_v53 = vld [vmem:[%s4485_s3 + $0x38] ss:$12 sps:$4 sm:$0xff]   ;;  %v3419_v55 = vld [vmem:[%s4485_s3 + $0x8] ss:$12 sps:$4 sm:$0xff]   ;;  %v3420_v56 = vld [vmem:[%s4485_s3 + $0xb0] ss:$12 sps:$4 sm:$0xff]  }
  0x13   :  { %256 = vmatpush1.bf16.msra.mxu1 %v3378_v19  ;;  %v3421_v57 = vld [vmem:[%s4485_s3 + $0x98] ss:$12 sps:$4 sm:$0xff]   ;;  %v3422_v58 = vld [vmem:[%s4485_s3 + $0x80] ss:$12 sps:$4 sm:$0xff]   ;;  %v3423_v59 = vld [vmem:[%s4485_s3 + $0x68] ss:$12 sps:$4 sm:$0xff]  }
  0x14   :  { %257 = vmatprep.subr.bf16.mxu1 %v3382_v20  ;;  %590 = vmatpush1.bf16.msra.mxu0 %v3737_v21  ;;  %v3424_v60 = vld [vmem:[%s4485_s3 + $0x50] ss:$12 sps:$4 sm:$0xff]   ;;  %v3425_v61 = vld [vmem:[%s4485_s3 + $0x38] ss:$12 sps:$4 sm:$0xff]   ;;  %v3426_v62 = vld [vmem:[%s4485_s3 + $0x20] ss:$12 sps:$4 sm:$0xff]  }
  0x15   :  { %591 = vmatprep.subr.bf16.mxu0 %v3743_v22  ;;  %v3427_v63 = vld [vmem:[%s4485_s3 + $0x8] ss:$12 sps:$4 sm:$0xff]   ;;  %v78_v5 = vld [vmem:[%s4488_s4] sm:$0x7] }
  0x16   :  { %v87_v20 = vrot.slane %v78_v5, %v86_v9 }
  0x17   :  { %258 = vmatpush1.bf16.msra.mxu1 %v3384_v23 }
  0x18   :  { %259 = vmatprep.subr.bf16.mxu1 %v3388_v24  ;;  %592 = vmatpush1.bf16.msra.mxu0 %v3755_v25 }
  0x19   :  { %593 = vmatprep.subr.bf16.mxu0 %v3761_v26 }
  0x1b   :  { %260 = vmatpush1.bf16.msra.mxu1 %v3390_v27 }
  0x1c   :  { %261 = vmatprep.subr.bf16.mxu1 %v3394_v29  ;;  %594 = vmatpush1.bf16.msra.mxu0 %v3769_v28 }
  0x1d   :  { %595 = vmatprep.subr.bf16.mxu0 %v3782_v31 }
  0x1f   :  { %262 = vmatpush1.bf16.msra.mxu1 %v3396_v30 }
  0x20   :  { %3141 = vmatprep.subr.bf16.mxu1 %v3401_v33  ;;  %596 = vmatpush1.bf16.msra.mxu0 %v3787_v32 }
  0x21   :  { %855 = vmatprep.subr.bf16.mxu0 %v3657_v3 }
  0x22   :  { %280 = vmatmul.mubr.bf16.vlgmr.msra.gmra.mxu1 %v3400_v35 }
  0x23   :  { %3142 = vmatpush3.bf16.msra.mxu1 %v3401_v33  ;;  %289 = vmatprep.mubr.bf16.mxu1 %v3593_v1 }
  0x24   :  { %614 = vmatmul.mubr.bf16.vlgmr.msra.gmra.mxu0 %v3804_v36  ;;  %3143 = vmatprep.subr.bf16.mxu1 %v3402_v37 }
  0x25   :  { %856 = vmatpush1.bf16.msra.mxu0 %v3662_v4  ;;  %887 = vmatprep.mubr.bf16.mxu0 %v3593_v1 }
  0x26   :  { %857 = vmatprep.subr.bf16.mxu0 %v3674_v7 }
  0x27   :  { %3144 = vmatpush3.bf16.msra.mxu1 %v3402_v37 }
  0x28   :  { %3145 = vmatprep.subr.bf16.mxu1 %v3404_v38 }
  0x29   :  { %858 = vmatpush1.bf16.msra.mxu0 %v3680_v8 }
  0x2a   :  { %290 = vmatmul.mubr.bf16.gmra.mxu1 %v3403_v39  ;;  %859 = vmatprep.subr.bf16.mxu0 %v3692_v11 }
  0x2b   :  { %3146 = vmatpush3.bf16.msra.mxu1 %v3404_v38  ;;  %299 = vmatprep.mubr.bf16.mxu1 %v3593_v1 }
  0x2c   :  { %3147 = vmatprep.subr.bf16.mxu1 %v3405_v40 }
  0x2d   :  { %860 = vmatpush1.bf16.msra.mxu0 %v3701_v13 }
  0x2e   :  { %861 = vmatprep.subr.bf16.mxu0 %v3707_v14 }
  0x2f   :  { %3148 = vmatpush3.bf16.msra.mxu1 %v3405_v40 }
  0x30   :  { %3149 = vmatprep.subr.bf16.mxu1 %v3407_v41 }
  0x31   :  { %862 = vmatpush1.bf16.msra.mxu0 %v3719_v17 }
  0x32   :  { %300 = vmatmul.mubr.bf16.gmra.mxu1 %v3406_v42  ;;  %863 = vmatprep.subr.bf16.mxu0 %v3725_v18 }
  0x33   :  { %3150 = vmatpush3.bf16.msra.mxu1 %v3407_v41  ;;  %309 = vmatprep.mubr.bf16.mxu1 %v3593_v1 }
  0x34   :  { %3151 = vmatprep.subr.bf16.mxu1 %v3408_v43 }
  0x35   :  { %864 = vmatpush1.bf16.msra.mxu0 %v3737_v21 }
  0x36   :  { %865 = vmatprep.subr.bf16.mxu0 %v3743_v22 }
  0x37   :  { %3152 = vmatpush3.bf16.msra.mxu1 %v3408_v43 }
  0x38   :  { %3153 = vmatprep.subr.bf16.mxu1 %v3410_v44 }
  0x39   :  { %866 = vmatpush1.bf16.msra.mxu0 %v3755_v25 }
  0x3a   :  { %310 = vmatmul.mubr.bf16.gmra.mxu1 %v3409_v45  ;;  %867 = vmatprep.subr.bf16.mxu0 %v3761_v26 }
  0x3b   :  { %3154 = vmatpush3.bf16.msra.mxu1 %v3410_v44  ;;  %3157 = vmatprep.mubr.bf16.mxu1 %v3400_v35 }
  0x3c   :  { %3155 = vmatprep.subr.bf16.mxu1 %v3411_v46 }
  0x3d   :  { %868 = vmatpush1.bf16.msra.mxu0 %v3769_v28 }
  0x3e   :  { %869 = vmatprep.subr.bf16.mxu0 %v3782_v31 }
  0x3f   :  { %3156 = vmatpush3.bf16.msra.mxu1 %v3411_v46 }
  0x40   :  { %3165 = vmatprep.subr.bf16.mxu1 %v3594_v48 }
  0x41   :  { %870 = vmatpush1.bf16.msra.mxu0 %v3787_v32 }
  0x42   :  { %3158 = vmatmul.mubr.bf16.vlgmr.msra.gmra.mxu1 %v3403_v39  ;;  %1129 = vmatprep.subr.bf16.mxu0 %v3657_v3  ;;  %v82_v3 = vsub.s32 0, %v81_v2 }
  0x43   :  { %3166 = vmatpush3.bf16.msra.mxu1 %v3412_v47  ;;  %3161 = vmatprep.mubr.bf16.mxu1 %v3406_v42 }
  0x44   :  { %3167 = vmatprep.subr.bf16.mxu1 %v3594_v48  ;;  %v83_v15 = vrot.slane %v78_v5, %v82_v3 }
  0x47   :  { %3168 = vmatpush3.bf16.msra.mxu1 %v3413_v49 }
  0x48   :  { %3169 = vmatprep.subr.bf16.mxu1 %v3594_v48 }
  0x4a   :  { %3162 = vmatmul.mubr.bf16.gmra.mxu1 %v3409_v45 }
  0x4b   :  { %3170 = vmatpush3.bf16.msra.mxu1 %v3414_v50  ;;  %3181 = vmatprep.mubr.msk.bf16.mxu1 %vm3595_vm0, %v3594_v48 }
  0x4c   :  { %3171 = vmatprep.subr.bf16.mxu1 %v3594_v48 }
  0x4f   :  { %3172 = vmatpush3.bf16.msra.mxu1 %v3415_v51 }
  0x50   :  { %3173 = vmatprep.subr.bf16.mxu1 %v3594_v48 }
  0x53   :  { %3174 = vmatpush3.bf16.msra.mxu1 %v3416_v52 }
  0x54   :  { %3175 = vmatprep.subr.bf16.mxu1 %v3594_v48 }
  0x57   :  { %3176 = vmatpush3.bf16.msra.mxu1 %v3417_v53 }
  0x58   :  { %3177 = vmatprep.subr.bf16.mxu1 %v3594_v48 }
  0x5b   :  { %3178 = vmatpush3.bf16.msra.mxu1 %v3418_v54 }
  0x5c   :  { %3179 = vmatprep.subr.bf16.mxu1 %v3594_v48 }
  0x5f   :  { %3180 = vmatpush3.bf16.msra.mxu1 %v3419_v55  ;;  %v90_v55 = vsub.s32 2, %v81_v2 }
  0x60   :  { %3185 = vmatprep.subr.bf16.mxu1 %v3594_v48 }
  0x62   :  { %3182 = vmatmul.mubr.bf16.vlgmr.msra.gmra.mxu1 %v3804_v36 }
  0x63   :  { %3201 = vmatprep.mubr.msk.bf16.mxu1 %vm3595_vm0, %v3594_v48  ;;  %3186 = vmatpush3.bf16.msra.mxu1 %v3420_v56 }
  0x64   :  { %3187 = vmatprep.subr.bf16.mxu1 %v3594_v48 }
  0x67   :  { %3188 = vmatpush3.bf16.msra.mxu1 %v3421_v57 }
  0x68   :  { %3189 = vmatprep.subr.bf16.mxu1 %v3594_v48 }
  0x6b   :  { %3190 = vmatpush3.bf16.msra.mxu1 %v3422_v58 }
  0x6c   :  { %3191 = vmatprep.subr.bf16.mxu1 %v3594_v48 }
  0x6f   :  { %3192 = vmatpush3.bf16.msra.mxu1 %v3423_v59 }
  0x70   :  { %3193 = vmatprep.subr.bf16.mxu1 %v3594_v48 }
  0x73   :  { %3194 = vmatpush3.bf16.msra.mxu1 %v3424_v60 }
  0x74   :  { %3195 = vmatprep.subr.bf16.mxu1 %v3594_v48 }
  0x77   :  { %3196 = vmatpush3.bf16.msra.mxu1 %v3425_v61  ;;  %v91_v61 = vrot.slane %v78_v5, %v90_v55 }
  0x78   :  { %3197 = vmatprep.subr.bf16.mxu1 %v3594_v48 }
  0x7b   :  { %3198 = vmatpush3.bf16.msra.mxu1 %v3426_v62 }
  0x7c   :  { %3199 = vmatprep.subr.bf16.mxu1 %v3594_v48 }
  0x7f   :  { %3200 = vmatpush3.bf16.msra.mxu1 %v3427_v63 }
  0x80   :  { %3205 = vmatprep.subr.bf16.mxu1 %v3594_v48 }
  0xe2   :  { %v281_v6 = vpop.f32.mrf.mxu1 }
  0xe3   :  { %v282_v47 = vadd.f32 %v281_v6, %v83_v15 }
  0xe4   :  { %v283_v10 = vpop.f32.mrf.mxu1  ;;  %v615_v12 = vpop.f32.mrf.mxu0 }
  0xe5   :  { %v662_v53 = vadd.f32 %v615_v12, %v282_v47  ;;  %v284_v9 = vadd.f32 %v283_v10, %v87_v20 }
  0xe6   :  { %v285_v16 = vpop.f32.mrf.mxu1  ;;  %v617_v19 = vpop.f32.mrf.mxu0 }
  0xe7   :  { %v3932_v23 = vadd.f32 %v285_v16, %v83_v15  ;;  %v2848_v59 = vmul.f32 -1.442695, %v662_v53 }
  0xe8   :  { %v287_v24 = vpop.f32.mrf.mxu1  ;;  %v619_v27 = vpop.f32.mrf.mxu0 }
  0xe9   :  { %v3934_v29 = vadd.f32 %v287_v24, %v87_v20  ;;  %3512 = vpow2.f32 %v2848_v59  ;;  %v669_v24 = vadd.f32 %v617_v19, %v284_v9 }
  0xea   :  { %v291_v30 = vpop.f32.mrf.mxu1  ;;  %v620_v33 = vpop.f32.mrf.mxu0 }
  0xeb   :  { %v3936_v35 = vadd.f32 %v291_v30, %v83_v15  ;;  %v2849_v33 = vmul.f32 -1.442695, %v669_v24 }
  0xec   :  { %v293_v36 = vpop.f32.mrf.mxu1 }
  0xed   :  { %v3938_v37 = vadd.f32 %v293_v36, %v87_v20  ;;  %3514 = vpow2.f32 %v2849_v33 }
  0xee   :  { %v295_v38 = vpop.f32.mrf.mxu1 }
  0xef   :  { %v3940_v39 = vadd.f32 %v295_v38, %v83_v15 }
  0xf0   :  { %v297_v40 = vpop.f32.mrf.mxu1 }
  0xf1   :  { %v3942_v41 = vadd.f32 %v297_v40, %v87_v20 }
  0xf2   :  { %v301_v42 = vpop.f32.mrf.mxu1 }
  0xf3   :  { %v3944_v43 = vadd.f32 %v301_v42, %v83_v15 }
  0xf4   :  { %v303_v44 = vpop.f32.mrf.mxu1 }
  0xf5   :  { %v3946_v45 = vadd.f32 %v303_v44, %v87_v20 }
  0xf6   :  { %v305_v46 = vpop.f32.mrf.mxu1  ;;  %v3513_v42 = vpop.eup %3512 }
  0xf7   :  { %v3948_v49 = vadd.f32 %v305_v46, %v83_v15  ;;  %v3977_v46 = vld [vmem:[%s4489_s5] ss:$0 sm:$0xff] }
  0xf8   :  { %v307_v50 = vpop.f32.mrf.mxu1 }
  0xf9   :  { %v3950_v51 = vadd.f32 %v307_v50, %v87_v20 }
  0xfa   :  { %v311_v52 = vpop.f32.mrf.mxu1  ;;  %v3515_v19 = vpop.eup %3514 }
  0xfb   :  { %v3952_v54 = vadd.f32 %v311_v52, %v83_v15  ;;  %v673_v47 = vadd.f32 1.0, %v3515_v19 }
  0xfc   :  { %v313_v56 = vpop.f32.mrf.mxu1 }
  0xfd   :  { %v3954_v57 = vadd.f32 %v313_v56, %v87_v20 }
  0xfe   :  { %v315_v58 = vpop.f32.mrf.mxu1 }
  0xff   :  { %v3956_v60 = vadd.f32 %v315_v58, %v83_v15 }
 0x100   :  { %v317_v62 = vpop.f32.mrf.mxu1 }
 0x101   :  { %v3958_v63 = vadd.f32 %v317_v62, %v87_v20  ;;  %v666_v20 = vadd.f32 1.0, %v3513_v42 }
 0x102   :  { %v3159_v0 = vpop.f32.mrf.mxu1 }
 0x103   :  { %v3960_v3 = vadd.f32 %v3159_v0, %v91_v61  ;;  %3516 = vrcp.f32 %v666_v20 }
 0x104   :  { %v354_v6 = vpop.f32.mrf.mxu1  ;;  %3518 = vrcp.f32 %v673_v47 }
 0x105   :  { %v355_v56 = vadd.f32 %v354_v6, %v91_v61 }
 0x106   :  { %v3160_v12 = vpop.f32.mrf.mxu1 }
 0x107   :  { %v3962_v16 = vadd.f32 %v3160_v12, %v91_v61 }
 0x108   :  { %v357_v2 = vpop.f32.mrf.mxu1 }
 0x109   :  { %v3964_v27 = vadd.f32 %v357_v2, %v91_v61 }
 0x10a   :  { %v3163_v30 = vpop.f32.mrf.mxu1 }
 0x10b   :  { %v3966_v15 = vadd.f32 %v3163_v30, %v91_v61 }
 0x10c   :  { %v370_v5 = vpop.f32.mrf.mxu1 }
 0x10d   :  { %v3968_v36 = vadd.f32 %v370_v5, %v91_v61 }
 0x10e   :  { %v3164_v38 = vpop.f32.mrf.mxu1 }
 0x10f   :  { %v3970_v40 = vadd.f32 %v3164_v38, %v91_v61 }
 0x110   :  { %v373_v44 = vpop.f32.mrf.mxu1  ;;  %v3517_v53 = vpop.eup %3516 }
 0x111   :  { %v3972_v10 = vadd.f32 %v373_v44, %v91_v61  ;;  %v3519_v9 = vpop.eup %3518 }
 0x112   :  { %v680_v12 = vsub.f32 1.0, %v3519_v9  ;;  %v682_v30 = vmul.f32 %v3519_v9, %v3796_v34  ;;  %v4055_v9 = vld [vmem:[%s4485_s3 + $0xa8] ss:$12 sps:$4 sm:$0xff]  }
 0x122   :  { %v656_v50 = vpop.f32.mrf.mxu1 }
 0x123   :  { %v676_v52 = vadd.f32 %v3977_v46, %v656_v50 }
 0x124   :  { %v3183_v55 = vpop.f32.mrf.mxu1 }
 0x125   :  { %v677_v58 = vmul.f32 %v3517_v53, %v676_v52 }
 0x126   :  { %v659_v59 = vpop.f32.mrf.mxu1 }
 0x127   :  { %v678_v62 = vadd.f32 %v677_v58, %v355_v56 }
 0x128   :  { %v3184_v0 = vpop.f32.mrf.mxu1 }
 0x129   :  { %3520 = vtanh.f32 %v678_v62 }
 0x136   :  { %v3521_v2 = vpop.eup %3520 }
 0x137   :  { %v681_v24 = vmul.f32 %v3521_v2, %v680_v12  ;;  %v3439_v12 = vld [vmem:[%s4485_s3 + $0xb0] ss:$12 sps:$4 sm:$0xff]   ;;  %v4065_v2 = vld [vmem:[%s4485_s3 + $0x94] ss:$12 sps:$4 sm:$0xff]  }
 0x139   :  { %v3981_v5 = vadd.f32 %v682_v30, %v681_v24  ;;  %v4071_v24 = vld [vmem:[%s4485_s3 + $0x90] ss:$12 sps:$4 sm:$0xff]   ;;  %v3443_v30 = vld [vmem:[%s4485_s3 + $0x98] ss:$12 sps:$4 sm:$0xff]  }
 0x13b   :  { %v684_v33 = vpack.c.bf16 %v3981_v5, %v3981_v5 }
 0x13d   :  { %685 = vst [vmem:[#allocation4] sm:$0xf] %v684_v33  ;;  %888 = vmatmul.mubr.bf16.vlgmr.msra.gmra.mxu0 %v684_v33  ;;  %3202 = vmatmul.mubr.bf16.vlgmr.msra.gmra.mxu1 %v684_v33  ;;  %v4087_v33 = vld [vmem:[%s4485_s3 + $0x78] ss:$12 sps:$4 sm:$0xff]  }
 0x13e   :  { %1130 = vmatpush1.bf16.msra.mxu0 %v3662_v4  ;;  %1161 = vmatprep.mubr.bf16.mxu0 %v3593_v1  ;;  %v3428_v4 = vld [vmem:[%s4485_s3 + $0xb0] ss:$12 sps:$4 sm:$0xff]  }
 0x13f   :  { %1131 = vmatprep.subr.bf16.mxu0 %v3674_v7  ;;  %3221 = vmatprep.mubr.msk.bf16.mxu1 %vm3595_vm0, %v3594_v48  ;;  %v3429_v7 = vld [vmem:[%s4485_s3 + $0x98] ss:$12 sps:$4 sm:$0xff]  }
 0x140   :  { %3206 = vmatpush3.bf16.msra.mxu1 %v3428_v4  ;;  %v3447_v4 = vld [vmem:[%s4485_s3 + $0x80] ss:$12 sps:$4 sm:$0xff]  }
 0x141   :  { %3207 = vmatprep.subr.bf16.mxu1 %v3594_v48 }
 0x142   :  { %1132 = vmatpush1.bf16.msra.mxu0 %v3680_v8  ;;  %v3430_v8 = vld [vmem:[%s4485_s3 + $0x80] ss:$12 sps:$4 sm:$0xff]  }
 0x143   :  { %1133 = vmatprep.subr.bf16.mxu0 %v3692_v11  ;;  %v3431_v11 = vld [vmem:[%s4485_s3 + $0x68] ss:$12 sps:$4 sm:$0xff]  }
 0x144   :  { %3208 = vmatpush3.bf16.msra.mxu1 %v3429_v7  ;;  %v4097_v7 = vld [vmem:[%s4485_s3 + $0x64] ss:$12 sps:$4 sm:$0xff]  }
 0x145   :  { %3209 = vmatprep.subr.bf16.mxu1 %v3594_v48 }
 0x146   :  { %1134 = vmatpush1.bf16.msra.mxu0 %v3701_v13  ;;  %v3432_v13 = vld [vmem:[%s4485_s3 + $0x50] ss:$12 sps:$4 sm:$0xff]  }
 0x147   :  { %1135 = vmatprep.subr.bf16.mxu0 %v3707_v14  ;;  %v3433_v14 = vld [vmem:[%s4485_s3 + $0x38] ss:$12 sps:$4 sm:$0xff]  }
 0x148   :  { %3210 = vmatpush3.bf16.msra.mxu1 %v3430_v8  ;;  %v4103_v8 = vld [vmem:[%s4485_s3 + $0x60] ss:$12 sps:$4 sm:$0xff]  }
 0x149   :  { %3211 = vmatprep.subr.bf16.mxu1 %v3594_v48 }
 0x14a   :  { %1136 = vmatpush1.bf16.msra.mxu0 %v3719_v17  ;;  %v3434_v17 = vld [vmem:[%s4485_s3 + $0x20] ss:$12 sps:$4 sm:$0xff]  }
 0x14b   :  { %1137 = vmatprep.subr.bf16.mxu0 %v3725_v18  ;;  %v3435_v18 = vld [vmem:[%s4485_s3 + $0x8] ss:$12 sps:$4 sm:$0xff]  }
 0x14c   :  { %3212 = vmatpush3.bf16.msra.mxu1 %v3431_v11  ;;  %v3451_v11 = vld [vmem:[%s4485_s3 + $0x68] ss:$12 sps:$4 sm:$0xff]  }
 0x14d   :  { %3213 = vmatprep.subr.bf16.mxu1 %v3594_v48 }
 0x14e   :  { %1138 = vmatpush1.bf16.msra.mxu0 %v3737_v21 }
 0x14f   :  { %1139 = vmatprep.subr.bf16.mxu0 %v3743_v22 }
 0x150   :  { %3214 = vmatpush3.bf16.msra.mxu1 %v3432_v13  ;;  %v4112_v13 = vld [vmem:[%s4485_s3 + $0x4c] ss:$12 sps:$4 sm:$0xff]  }
 0x151   :  { %3215 = vmatprep.subr.bf16.mxu1 %v3594_v48 }
 0x152   :  { %1140 = vmatpush1.bf16.msra.mxu0 %v3755_v25 }
 0x153   :  { %1141 = vmatprep.subr.bf16.mxu0 %v3761_v26 }
 0x154   :  { %3216 = vmatpush3.bf16.msra.mxu1 %v3433_v14  ;;  %v4118_v14 = vld [vmem:[%s4485_s3 + $0x48] ss:$12 sps:$4 sm:$0xff]  }
 0x155   :  { %3217 = vmatprep.subr.bf16.mxu1 %v3594_v48 }
 0x156   :  { %1142 = vmatpush1.bf16.msra.mxu0 %v3769_v28 }
 0x157   :  { %1143 = vmatprep.subr.bf16.mxu0 %v3782_v31 }
 0x158   :  { %3218 = vmatpush3.bf16.msra.mxu1 %v3434_v17  ;;  %v3455_v17 = vld [vmem:[%s4485_s3 + $0x50] ss:$12 sps:$4 sm:$0xff]  }
 0x159   :  { %3219 = vmatprep.subr.bf16.mxu1 %v3594_v48 }
 0x15a   :  { %1144 = vmatpush1.bf16.msra.mxu0 %v3787_v32 }
 0x15c   :  { %3220 = vmatpush3.bf16.msra.mxu1 %v3435_v18  ;;  %v4128_v18 = vld [vmem:[%s4485_s3 + $0x34] ss:$12 sps:$4 sm:$0xff]  }
 0x15d   :  { %3225 = vmatprep.subr.bf16.mxu1 %v3594_v48 }
 0x1fd   :  { %v889_v21 = vpop.f32.mrf.mxu0  ;;  %v930_v22 = vpop.f32.mrf.mxu1 }
 0x1fe   :  { %v936_v25 = vadd.f32 %v889_v21, %v3932_v23  ;;  %v950_v50 = vadd.f32 %v3977_v46, %v930_v22  ;;  %v4134_v21 = vld [vmem:[%s4485_s3 + $0x30] ss:$12 sps:$4 sm:$0xff]   ;;  %v3459_v22 = vld [vmem:[%s4485_s3 + $0x38] ss:$12 sps:$4 sm:$0xff]  }
 0x1ff   :  { %v891_v26 = vpop.f32.mrf.mxu0  ;;  %v3203_v28 = vpop.f32.mrf.mxu1 }
 0x200   :  { %v2874_v31 = vmul.f32 -1.442695, %v936_v25  ;;  %v943_v38 = vadd.f32 %v891_v26, %v3934_v29  ;;  %v4144_v25 = vld [vmem:[%s4485_s3 + $0x1c] ss:$12 sps:$4 sm:$0xff]   ;;  %v4150_v26 = vld [vmem:[%s4485_s3 + $0x18] ss:$12 sps:$4 sm:$0xff]  }
 0x201   :  { %v893_v32 = vpop.f32.mrf.mxu0  ;;  %v933_v34 = vpop.f32.mrf.mxu1  ;;  %v3463_v28 = vld [vmem:[%s4485_s3 + $0x20] ss:$12 sps:$4 sm:$0xff]  }
 0x202   :  { %3522 = vpow2.f32 %v2874_v31  ;;  %v2875_v42 = vmul.f32 -1.442695, %v943_v38  ;;  %v4160_v31 = vld [vmem:[%s4485_s3 + $0x4] ss:$12 sps:$4 sm:$0xff]   ;;  %v4166_v32 = vld [vmem:[%s4485_s3] ss:$12 sps:$4 sm:$0xff]  }
 0x203   :  { %v894_v61 = vpop.f32.mrf.mxu0  ;;  %v3204_v6 = vpop.f32.mrf.mxu1  ;;  %v3467_v34 = vld [vmem:[%s4485_s3 + $0x8] ss:$12 sps:$4 sm:$0xff]  }
 0x204   :  { %3524 = vpow2.f32 %v2875_v42 }
 0x20f   :  { %v3523_v44 = vpop.eup %3522 }
 0x210   :  { %v940_v20 = vadd.f32 1.0, %v3523_v44 }
 0x211   :  { %v3525_v19 = vpop.eup %3524 }
 0x212   :  { %3526 = vrcp.f32 %v940_v20  ;;  %v947_v47 = vadd.f32 1.0, %v3525_v19 }
 0x214   :  { %3528 = vrcp.f32 %v947_v47 }
 0x21f   :  { %v3527_v23 = vpop.eup %3526 }
 0x220   :  { %v951_v52 = vmul.f32 %v3527_v23, %v950_v50 }
 0x221   :  { %v3529_v55 = vpop.eup %3528 }
 0x222   :  { %v952_v53 = vadd.f32 %v951_v52, %v3964_v27  ;;  %v954_v56 = vsub.f32 1.0, %v3529_v55  ;;  %v956_v29 = vmul.f32 %v3529_v55, %v3981_v5  ;;  %v4050_v27 = vld [vmem:[%s4485_s3 + $0xac] ss:$12 sps:$4 sm:$0xff]   ;;  %v4081_v5 = vld [vmem:[%s4485_s3 + $0x7c] ss:$12 sps:$4 sm:$0xff]  }
 0x223   :  { %1403 = vmatprep.subr.bf16.mxu0 %v4050_v27 }
 0x224   :  { %3530 = vtanh.f32 %v952_v53 }
 0x231   :  { %v3531_v58 = vpop.eup %3530 }
 0x232   :  { %v955_v59 = vmul.f32 %v3531_v58, %v954_v56 }
 0x234   :  { %v4040_v62 = vadd.f32 %v956_v29, %v955_v59 }
 0x236   :  { %v958_v0 = vpack.c.bf16 %v4040_v62, %v4040_v62 }
 0x238   :  { %959 = vst [vmem:[#allocation4 + $0x4] sm:$0xf] %v958_v0  ;;  %1162 = vmatmul.mubr.bf16.vlgmr.msra.gmra.mxu0 %v958_v0  ;;  %3222 = vmatmul.mubr.bf16.vlgmr.msra.gmra.mxu1 %v958_v0 }
 0x239   :  { %1435 = vmatprep.mubr.bf16.mxu0 %v3593_v1  ;;  %3241 = vmatprep.mubr.msk.bf16.mxu1 %vm3595_vm0, %v3594_v48 }
 0x23a   :  { %1404 = vmatpush1.bf16.msra.mxu0 %v4055_v9  ;;  %3226 = vmatpush3.bf16.msra.mxu1 %v3439_v12 }
 0x23b   :  { %3227 = vmatprep.subr.bf16.mxu1 %v3594_v48  ;;  %1405 = vmatprep.subr.bf16.mxu0 %v4065_v2 }
 0x23e   :  { %1406 = vmatpush1.bf16.msra.mxu0 %v4071_v24  ;;  %3228 = vmatpush3.bf16.msra.mxu1 %v3443_v30 }
 0x23f   :  { %3229 = vmatprep.subr.bf16.mxu1 %v3594_v48  ;;  %1407 = vmatprep.subr.bf16.mxu0 %v4081_v5 }
 0x242   :  { %1408 = vmatpush1.bf16.msra.mxu0 %v4087_v33  ;;  %3230 = vmatpush3.bf16.msra.mxu1 %v3447_v4 }
 0x243   :  { %3231 = vmatprep.subr.bf16.mxu1 %v3594_v48  ;;  %1409 = vmatprep.subr.bf16.mxu0 %v4097_v7 }
 0x246   :  { %1410 = vmatpush1.bf16.msra.mxu0 %v4103_v8  ;;  %3232 = vmatpush3.bf16.msra.mxu1 %v3451_v11 }
 0x247   :  { %1411 = vmatprep.subr.bf16.mxu0 %v4112_v13  ;;  %3233 = vmatprep.subr.bf16.mxu1 %v3594_v48 }
 0x24a   :  { %1412 = vmatpush1.bf16.msra.mxu0 %v4118_v14  ;;  %3234 = vmatpush3.bf16.msra.mxu1 %v3455_v17 }
 0x24b   :  { %1413 = vmatprep.subr.bf16.mxu0 %v4128_v18  ;;  %3235 = vmatprep.subr.bf16.mxu1 %v3594_v48 }
 0x24e   :  { %1414 = vmatpush1.bf16.msra.mxu0 %v4134_v21  ;;  %3236 = vmatpush3.bf16.msra.mxu1 %v3459_v22 }
 0x24f   :  { %1415 = vmatprep.subr.bf16.mxu0 %v4144_v25  ;;  %3237 = vmatprep.subr.bf16.mxu1 %v3594_v48 }
 0x252   :  { %1416 = vmatpush1.bf16.msra.mxu0 %v4150_v26  ;;  %3238 = vmatpush3.bf16.msra.mxu1 %v3463_v28 }
 0x253   :  { %1417 = vmatprep.subr.bf16.mxu0 %v4160_v31  ;;  %3239 = vmatprep.subr.bf16.mxu1 %v3594_v48 }
 0x256   :  { %1418 = vmatpush1.bf16.msra.mxu0 %v4166_v32  ;;  %3240 = vmatpush3.bf16.msra.mxu1 %v3467_v34  ;;  %v3470_v34 = vld [vmem:[%s4485_s3 + $0x80] ss:$12 sps:$4 sm:$0xff]  }
 0x257   :  { %1677 = vmatprep.subr.bf16.mxu0 %v4050_v27  ;;  %3245 = vmatprep.subr.bf16.mxu1 %v3594_v48 }
 0x2f8   :  { %v1163_v61 = vpop.f32.mrf.mxu0  ;;  %v1204_v6 = vpop.f32.mrf.mxu1 }
 0x2f9   :  { %v1210_v38 = vadd.f32 %v1163_v61, %v3936_v35  ;;  %v1224_v29 = vadd.f32 %v3977_v46, %v1204_v6  ;;  %v3471_v61 = vld [vmem:[%s4485_s3 + $0x68] ss:$12 sps:$4 sm:$0xff]   ;;  %v3472_v6 = vld [vmem:[%s4485_s3 + $0x50] ss:$12 sps:$4 sm:$0xff]  }
 0x2fa   :  { %v1165_v42 = vpop.f32.mrf.mxu0  ;;  %v3223_v44 = vpop.f32.mrf.mxu1 }
 0x2fb   :  { %v2900_v20 = vmul.f32 -1.442695, %v1210_v38  ;;  %v1217_v52 = vadd.f32 %v1165_v42, %v3938_v37  ;;  %v3473_v38 = vld [vmem:[%s4485_s3 + $0x38] ss:$12 sps:$4 sm:$0xff]   ;;  %v3474_v42 = vld [vmem:[%s4485_s3 + $0x20] ss:$12 sps:$4 sm:$0xff]  }
 0x2fc   :  { %v1167_v19 = vpop.f32.mrf.mxu0  ;;  %v1207_v47 = vpop.f32.mrf.mxu1  ;;  %v3475_v44 = vld [vmem:[%s4485_s3 + $0x8] ss:$12 sps:$4 sm:$0xff]  }
 0x2fd   :  { %3532 = vpow2.f32 %v2900_v20  ;;  %v2901_v53 = vmul.f32 -1.442695, %v1217_v52 }
 0x2fe   :  { %v1168_v50 = vpop.f32.mrf.mxu0  ;;  %v3224_v23 = vpop.f32.mrf.mxu1 }
 0x2ff   :  { %3534 = vpow2.f32 %v2901_v53 }
 0x30a   :  { %v3533_v55 = vpop.eup %3532 }
 0x30b   :  { %v1214_v56 = vadd.f32 1.0, %v3533_v55 }
 0x30c   :  { %v3535_v58 = vpop.eup %3534 }
 0x30d   :  { %3536 = vrcp.f32 %v1214_v56  ;;  %v1221_v59 = vadd.f32 1.0, %v3535_v58 }
 0x30f   :  { %3538 = vrcp.f32 %v1221_v59 }
 0x31a   :  { %v3537_v35 = vpop.eup %3536 }
 0x31b   :  { %v1225_v0 = vmul.f32 %v3537_v35, %v1224_v29 }
 0x31c   :  { %v3539_v30 = vpop.eup %3538 }
 0x31d   :  { %v1226_v12 = vadd.f32 %v1225_v0, %v3960_v3  ;;  %v1228_v4 = vsub.f32 1.0, %v3539_v30  ;;  %v1230_v37 = vmul.f32 %v3539_v30, %v4040_v62  ;;  %v3468_v3 = vld [vmem:[%s4485_s3 + $0xb0] ss:$12 sps:$4 sm:$0xff]   ;;  %v3469_v62 = vld [vmem:[%s4485_s3 + $0x98] ss:$12 sps:$4 sm:$0xff]  }
 0x31f   :  { %3540 = vtanh.f32 %v1226_v12 }
 0x32c   :  { %v3541_v11 = vpop.eup %3540 }
 0x32d   :  { %v1229_v17 = vmul.f32 %v3541_v11, %v1228_v4 }
 0x32f   :  { %v4181_v22 = vadd.f32 %v1230_v37, %v1229_v17 }
 0x331   :  { %v1232_v28 = vpack.c.bf16 %v4181_v22, %v4181_v22 }
 0x333   :  { %1233 = vst [vmem:[#allocation4 + $0x8] sm:$0xf] %v1232_v28  ;;  %1436 = vmatmul.mubr.bf16.vlgmr.msra.gmra.mxu0 %v1232_v28  ;;  %3242 = vmatmul.mubr.bf16.vlgmr.msra.gmra.mxu1 %v1232_v28 }
 0x334   :  { %1678 = vmatpush1.bf16.msra.mxu0 %v4055_v9  ;;  %1709 = vmatprep.mubr.bf16.mxu0 %v3593_v1 }
 0x335   :  { %1679 = vmatprep.subr.bf16.mxu0 %v4065_v2  ;;  %3261 = vmatprep.mubr.msk.bf16.mxu1 %vm3595_vm0, %v3594_v48 }
 0x336   :  { %3246 = vmatpush3.bf16.msra.mxu1 %v3468_v3 }
 0x337   :  { %3247 = vmatprep.subr.bf16.mxu1 %v3594_v48 }
 0x338   :  { %1680 = vmatpush1.bf16.msra.mxu0 %v4071_v24 }
 0x339   :  { %1681 = vmatprep.subr.bf16.mxu0 %v4081_v5 }
 0x33a   :  { %3248 = vmatpush3.bf16.msra.mxu1 %v3469_v62 }
 0x33b   :  { %3249 = vmatprep.subr.bf16.mxu1 %v3594_v48 }
 0x33c   :  { %1682 = vmatpush1.bf16.msra.mxu0 %v4087_v33 }
 0x33d   :  { %1683 = vmatprep.subr.bf16.mxu0 %v4097_v7 }
 0x33e   :  { %3250 = vmatpush3.bf16.msra.mxu1 %v3470_v34 }
 0x33f   :  { %3251 = vmatprep.subr.bf16.mxu1 %v3594_v48 }
 0x340   :  { %1684 = vmatpush1.bf16.msra.mxu0 %v4103_v8 }
 0x341   :  { %1685 = vmatprep.subr.bf16.mxu0 %v4112_v13 }
 0x342   :  { %3252 = vmatpush3.bf16.msra.mxu1 %v3471_v61 }
 0x343   :  { %3253 = vmatprep.subr.bf16.mxu1 %v3594_v48 }
 0x344   :  { %1686 = vmatpush1.bf16.msra.mxu0 %v4118_v14 }
 0x345   :  { %1687 = vmatprep.subr.bf16.mxu0 %v4128_v18 }
 0x346   :  { %3254 = vmatpush3.bf16.msra.mxu1 %v3472_v6  ;;  %v3478_v6 = vld [vmem:[%s4485_s3 + $0x80] ss:$12 sps:$4 sm:$0xff]  }
 0x347   :  { %3255 = vmatprep.subr.bf16.mxu1 %v3594_v48 }
 0x348   :  { %1688 = vmatpush1.bf16.msra.mxu0 %v4134_v21 }
 0x349   :  { %1689 = vmatprep.subr.bf16.mxu0 %v4144_v25 }
 0x34a   :  { %3256 = vmatpush3.bf16.msra.mxu1 %v3473_v38  ;;  %v3479_v38 = vld [vmem:[%s4485_s3 + $0x68] ss:$12 sps:$4 sm:$0xff]  }
 0x34b   :  { %3257 = vmatprep.subr.bf16.mxu1 %v3594_v48 }
 0x34c   :  { %1690 = vmatpush1.bf16.msra.mxu0 %v4150_v26 }
 0x34d   :  { %1691 = vmatprep.subr.bf16.mxu0 %v4160_v31 }
 0x34e   :  { %3258 = vmatpush3.bf16.msra.mxu1 %v3474_v42  ;;  %v3480_v42 = vld [vmem:[%s4485_s3 + $0x50] ss:$12 sps:$4 sm:$0xff]  }
 0x34f   :  { %3259 = vmatprep.subr.bf16.mxu1 %v3594_v48 }
 0x350   :  { %1692 = vmatpush1.bf16.msra.mxu0 %v4166_v32 }
 0x351   :  { %1951 = vmatprep.subr.bf16.mxu0 %v4050_v27 }
 0x352   :  { %3260 = vmatpush3.bf16.msra.mxu1 %v3475_v44  ;;  %v3481_v44 = vld [vmem:[%s4485_s3 + $0x38] ss:$12 sps:$4 sm:$0xff]  }
 0x353   :  { %3265 = vmatprep.subr.bf16.mxu1 %v3594_v48 }
 0x3f3   :  { %v1437_v20 = vpop.f32.mrf.mxu0  ;;  %v1478_v19 = vpop.f32.mrf.mxu1 }
 0x3f4   :  { %v1484_v47 = vadd.f32 %v1437_v20, %v3940_v39  ;;  %v1498_v4 = vadd.f32 %v3977_v46, %v1478_v19  ;;  %v3482_v20 = vld [vmem:[%s4485_s3 + $0x20] ss:$12 sps:$4 sm:$0xff]   ;;  %v3483_v19 = vld [vmem:[%s4485_s3 + $0x8] ss:$12 sps:$4 sm:$0xff]  }
 0x3f5   :  { %v1439_v50 = vpop.f32.mrf.mxu0  ;;  %v3243_v23 = vpop.f32.mrf.mxu1 }
 0x3f6   :  { %v2926_v52 = vmul.f32 -1.442695, %v1484_v47  ;;  %v1491_v59 = vadd.f32 %v1439_v50, %v3942_v41 }
 0x3f7   :  { %v1441_v53 = vpop.f32.mrf.mxu0  ;;  %v1481_v55 = vpop.f32.mrf.mxu1 }
 0x3f8   :  { %3542 = vpow2.f32 %v2926_v52  ;;  %v2927_v29 = vmul.f32 -1.442695, %v1491_v59 }
 0x3f9   :  { %v1442_v56 = vpop.f32.mrf.mxu0  ;;  %v3244_v58 = vpop.f32.mrf.mxu1 }
 0x3fa   :  { %3544 = vpow2.f32 %v2927_v29 }
 0x405   :  { %v3543_v35 = vpop.eup %3542 }
 0x406   :  { %v1488_v0 = vadd.f32 1.0, %v3543_v35 }
 0x407   :  { %v3545_v12 = vpop.eup %3544 }
 0x408   :  { %3546 = vrcp.f32 %v1488_v0  ;;  %v1495_v30 = vadd.f32 1.0, %v3545_v12 }
 0x40a   :  { %3548 = vrcp.f32 %v1495_v30 }
 0x415   :  { %v3547_v39 = vpop.eup %3546 }
 0x416   :  { %v1499_v11 = vmul.f32 %v3547_v39, %v1498_v4 }
 0x417   :  { %v3549_v37 = vpop.eup %3548 }
 0x418   :  { %v1500_v17 = vadd.f32 %v1499_v11, %v3962_v16  ;;  %v1502_v28 = vsub.f32 1.0, %v3549_v37  ;;  %v1504_v41 = vmul.f32 %v3549_v37, %v4181_v22  ;;  %v3476_v16 = vld [vmem:[%s4485_s3 + $0xb0] ss:$12 sps:$4 sm:$0xff]   ;;  %v3477_v22 = vld [vmem:[%s4485_s3 + $0x98] ss:$12 sps:$4 sm:$0xff]  }
 0x41a   :  { %3550 = vtanh.f32 %v1500_v17 }
 0x427   :  { %v3551_v3 = vpop.eup %3550 }
 0x428   :  { %v1503_v62 = vmul.f32 %v3551_v3, %v1502_v28 }
 0x42a   :  { %v4241_v34 = vadd.f32 %v1504_v41, %v1503_v62 }
 0x42c   :  { %v1506_v61 = vpack.c.bf16 %v4241_v34, %v4241_v34 }
 0x42e   :  { %1507 = vst [vmem:[#allocation4 + $0xc] sm:$0xf] %v1506_v61  ;;  %1710 = vmatmul.mubr.bf16.vlgmr.msra.gmra.mxu0 %v1506_v61  ;;  %3262 = vmatmul.mubr.bf16.vlgmr.msra.gmra.mxu1 %v1506_v61 }
 0x42f   :  { %1952 = vmatpush1.bf16.msra.mxu0 %v4055_v9  ;;  %1983 = vmatprep.mubr.bf16.mxu0 %v3593_v1 }
 0x430   :  { %1953 = vmatprep.subr.bf16.mxu0 %v4065_v2  ;;  %3281 = vmatprep.mubr.msk.bf16.mxu1 %vm3595_vm0, %v3594_v48 }
 0x431   :  { %3266 = vmatpush3.bf16.msra.mxu1 %v3476_v16 }
 0x432   :  { %3267 = vmatprep.subr.bf16.mxu1 %v3594_v48 }
 0x433   :  { %1954 = vmatpush1.bf16.msra.mxu0 %v4071_v24 }
 0x434   :  { %1955 = vmatprep.subr.bf16.mxu0 %v4081_v5 }
 0x435   :  { %3268 = vmatpush3.bf16.msra.mxu1 %v3477_v22  ;;  %v3486_v22 = vld [vmem:[%s4485_s3 + $0x80] ss:$12 sps:$4 sm:$0xff]  }
 0x436   :  { %3269 = vmatprep.subr.bf16.mxu1 %v3594_v48 }
 0x437   :  { %1956 = vmatpush1.bf16.msra.mxu0 %v4087_v33 }
 0x438   :  { %1957 = vmatprep.subr.bf16.mxu0 %v4097_v7 }
 0x439   :  { %3270 = vmatpush3.bf16.msra.mxu1 %v3478_v6  ;;  %v3488_v6 = vld [vmem:[%s4485_s3 + $0x50] ss:$12 sps:$4 sm:$0xff]  }
 0x43a   :  { %3271 = vmatprep.subr.bf16.mxu1 %v3594_v48 }
 0x43b   :  { %1958 = vmatpush1.bf16.msra.mxu0 %v4103_v8 }
 0x43c   :  { %1959 = vmatprep.subr.bf16.mxu0 %v4112_v13 }
 0x43d   :  { %3272 = vmatpush3.bf16.msra.mxu1 %v3479_v38  ;;  %v3489_v38 = vld [vmem:[%s4485_s3 + $0x38] ss:$12 sps:$4 sm:$0xff]  }
 0x43e   :  { %3273 = vmatprep.subr.bf16.mxu1 %v3594_v48 }
 0x43f   :  { %1960 = vmatpush1.bf16.msra.mxu0 %v4118_v14 }
 0x440   :  { %1961 = vmatprep.subr.bf16.mxu0 %v4128_v18 }
 0x441   :  { %3274 = vmatpush3.bf16.msra.mxu1 %v3480_v42  ;;  %v3490_v42 = vld [vmem:[%s4485_s3 + $0x20] ss:$12 sps:$4 sm:$0xff]  }
 0x442   :  { %3275 = vmatprep.subr.bf16.mxu1 %v3594_v48 }
 0x443   :  { %1962 = vmatpush1.bf16.msra.mxu0 %v4134_v21 }
 0x444   :  { %1963 = vmatprep.subr.bf16.mxu0 %v4144_v25 }
 0x445   :  { %3276 = vmatpush3.bf16.msra.mxu1 %v3481_v44  ;;  %v3491_v44 = vld [vmem:[%s4485_s3 + $0x8] ss:$12 sps:$4 sm:$0xff]  }
 0x446   :  { %3277 = vmatprep.subr.bf16.mxu1 %v3594_v48 }
 0x447   :  { %1964 = vmatpush1.bf16.msra.mxu0 %v4150_v26 }
 0x448   :  { %1965 = vmatprep.subr.bf16.mxu0 %v4160_v31 }
 0x449   :  { %3278 = vmatpush3.bf16.msra.mxu1 %v3482_v20 }
 0x44a   :  { %3279 = vmatprep.subr.bf16.mxu1 %v3594_v48 }
 0x44b   :  { %1966 = vmatpush1.bf16.msra.mxu0 %v4166_v32 }
 0x44c   :  { %2225 = vmatprep.subr.bf16.mxu0 %v4050_v27 }
 0x44d   :  { %3280 = vmatpush3.bf16.msra.mxu1 %v3483_v19 }
 0x44e   :  { %3285 = vmatprep.subr.bf16.mxu1 %v3594_v48 }
 0x4ee   :  { %v1711_v47 = vpop.f32.mrf.mxu0  ;;  %v1752_v50 = vpop.f32.mrf.mxu1 }
 0x4ef   :  { %v1758_v23 = vadd.f32 %v1711_v47, %v3944_v43  ;;  %v1772_v11 = vadd.f32 %v3977_v46, %v1752_v50 }
 0x4f0   :  { %v1713_v52 = vpop.f32.mrf.mxu0  ;;  %v3263_v53 = vpop.f32.mrf.mxu1 }
 0x4f1   :  { %v2952_v55 = vmul.f32 -1.442695, %v1758_v23  ;;  %v1765_v35 = vadd.f32 %v1713_v52, %v3946_v45 }
 0x4f2   :  { %v1715_v56 = vpop.f32.mrf.mxu0  ;;  %v1755_v58 = vpop.f32.mrf.mxu1 }
 0x4f3   :  { %3552 = vpow2.f32 %v2952_v55  ;;  %v2953_v0 = vmul.f32 -1.442695, %v1765_v35 }
 0x4f4   :  { %v1716_v59 = vpop.f32.mrf.mxu0  ;;  %v3264_v29 = vpop.f32.mrf.mxu1 }
 0x4f5   :  { %3554 = vpow2.f32 %v2953_v0 }
 0x500   :  { %v3553_v12 = vpop.eup %3552 }
 0x501   :  { %v1762_v30 = vadd.f32 1.0, %v3553_v12 }
 0x502   :  { %v3555_v4 = vpop.eup %3554 }
 0x503   :  { %3556 = vrcp.f32 %v1762_v30  ;;  %v1769_v39 = vadd.f32 1.0, %v3555_v4 }
 0x505   :  { %3558 = vrcp.f32 %v1769_v39 }
 0x510   :  { %v3557_v43 = vpop.eup %3556 }
 0x511   :  { %v1773_v17 = vmul.f32 %v3557_v43, %v1772_v11 }
 0x512   :  { %v3559_v28 = vpop.eup %3558 }
 0x513   :  { %v1774_v37 = vadd.f32 %v1773_v17, %v3968_v36  ;;  %v1776_v3 = vsub.f32 1.0, %v3559_v28  ;;  %v1778_v45 = vmul.f32 %v3559_v28, %v4241_v34  ;;  %v3484_v36 = vld [vmem:[%s4485_s3 + $0xb0] ss:$12 sps:$4 sm:$0xff]   ;;  %v3485_v34 = vld [vmem:[%s4485_s3 + $0x98] ss:$12 sps:$4 sm:$0xff]  }
 0x515   :  { %3560 = vtanh.f32 %v1774_v37 }
 0x522   :  { %v3561_v62 = vpop.eup %3560 }
 0x523   :  { %v1777_v41 = vmul.f32 %v3561_v62, %v1776_v3 }
 0x525   :  { %v4301_v61 = vadd.f32 %v1778_v45, %v1777_v41 }
 0x527   :  { %v1780_v16 = vpack.c.bf16 %v4301_v61, %v4301_v61 }
 0x529   :  { %1781 = vst [vmem:[#allocation4 + $0x10] sm:$0xf] %v1780_v16  ;;  %1984 = vmatmul.mubr.bf16.vlgmr.msra.gmra.mxu0 %v1780_v16  ;;  %3282 = vmatmul.mubr.bf16.vlgmr.msra.gmra.mxu1 %v1780_v16 }
 0x52a   :  { %2226 = vmatpush1.bf16.msra.mxu0 %v4055_v9  ;;  %2257 = vmatprep.mubr.bf16.mxu0 %v3593_v1 }
 0x52b   :  { %2227 = vmatprep.subr.bf16.mxu0 %v4065_v2  ;;  %3301 = vmatprep.mubr.msk.bf16.mxu1 %vm3595_vm0, %v3594_v48 }
 0x52c   :  { %3286 = vmatpush3.bf16.msra.mxu1 %v3484_v36 }
 0x52d   :  { %3287 = vmatprep.subr.bf16.mxu1 %v3594_v48 }
 0x52e   :  { %2228 = vmatpush1.bf16.msra.mxu0 %v4071_v24 }
 0x52f   :  { %2229 = vmatprep.subr.bf16.mxu0 %v4081_v5 }
 0x530   :  { %3288 = vmatpush3.bf16.msra.mxu1 %v3485_v34 }
 0x531   :  { %3289 = vmatprep.subr.bf16.mxu1 %v3594_v48 }
 0x532   :  { %2230 = vmatpush1.bf16.msra.mxu0 %v4087_v33 }
 0x533   :  { %2231 = vmatprep.subr.bf16.mxu0 %v4097_v7 }
 0x534   :  { %3290 = vmatpush3.bf16.msra.mxu1 %v3486_v22 }
 0x535   :  { %3291 = vmatprep.subr.bf16.mxu1 %v3594_v48 }
 0x536   :  { %2232 = vmatpush1.bf16.msra.mxu0 %v4103_v8 }
 0x537   :  { %2233 = vmatprep.subr.bf16.mxu0 %v4112_v13 }
 0x53a   :  { %2234 = vmatpush1.bf16.msra.mxu0 %v4118_v14 }
 0x53b   :  { %2235 = vmatprep.subr.bf16.mxu0 %v4128_v18 }
 0x53e   :  { %2236 = vmatpush1.bf16.msra.mxu0 %v4134_v21 }
 0x53f   :  { %2237 = vmatprep.subr.bf16.mxu0 %v4144_v25 }
 0x542   :  { %2238 = vmatpush1.bf16.msra.mxu0 %v4150_v26 }
 0x543   :  { %2239 = vmatprep.subr.bf16.mxu0 %v4160_v31 }
 0x546   :  { %2240 = vmatpush1.bf16.msra.mxu0 %v4166_v32 }
 0x547   :  { %2499 = vmatprep.subr.bf16.mxu0 %v4050_v27  ;;  %v3487_v27 = vld [vmem:[%s4485_s3 + $0x68] ss:$12 sps:$4 sm:$0xff]  }
 0x548   :  { %3292 = vmatpush3.bf16.msra.mxu1 %v3487_v27 }
 0x549   :  { %3293 = vmatprep.subr.bf16.mxu1 %v3594_v48 }
 0x54c   :  { %3294 = vmatpush3.bf16.msra.mxu1 %v3488_v6 }
 0x54d   :  { %3295 = vmatprep.subr.bf16.mxu1 %v3594_v48 }
 0x550   :  { %3296 = vmatpush3.bf16.msra.mxu1 %v3489_v38 }
 0x551   :  { %3297 = vmatprep.subr.bf16.mxu1 %v3594_v48 }
 0x554   :  { %3298 = vmatpush3.bf16.msra.mxu1 %v3490_v42 }
 0x555   :  { %3299 = vmatprep.subr.bf16.mxu1 %v3594_v48 }
 0x558   :  { %3300 = vmatpush3.bf16.msra.mxu1 %v3491_v44 }
 0x559   :  { %3305 = vmatprep.subr.bf16.mxu1 %v3594_v48 }
 0x5e9   :  { %v1985_v20 = vpop.f32.mrf.mxu0  ;;  %v2026_v19 = vpop.f32.mrf.mxu1 }
 0x5ea   :  { %v2032_v47 = vadd.f32 %v1985_v20, %v3948_v49  ;;  %v2046_v4 = vadd.f32 %v3977_v46, %v2026_v19 }
 0x5eb   :  { %v1987_v50 = vpop.f32.mrf.mxu0  ;;  %v3283_v23 = vpop.f32.mrf.mxu1 }
 0x5ec   :  { %v2978_v52 = vmul.f32 -1.442695, %v2032_v47  ;;  %v2039_v59 = vadd.f32 %v1987_v50, %v3950_v51  ;;  %v3501_v23 = vld [vmem:[#allocation4] sm:$0xff]  }
 0x5ed   :  { %v1989_v53 = vpop.f32.mrf.mxu0  ;;  %v2029_v55 = vpop.f32.mrf.mxu1 }
 0x5ee   :  { %3562 = vpow2.f32 %v2978_v52  ;;  %v2979_v29 = vmul.f32 -1.442695, %v2039_v59  ;;  %v3504_v52 = vld [vmem:[%s4490_s6 + $0x20] sm:$0xff]   ;;  %v3505_v53 = vld [vmem:[%s4490_s6 + $0x18] sm:$0xff]   ;;  %v3506_v55 = vld [vmem:[%s4490_s6 + $0x10] sm:$0xff]  }
 0x5ef   :  { %v1990_v56 = vpop.f32.mrf.mxu0  ;;  %v3284_v58 = vpop.f32.mrf.mxu1  ;;  %v3509_v59 = vld [vmem:[#allocation4 + $0x8] sm:$0xff]  }
 0x5f0   :  { %3564 = vpow2.f32 %v2979_v29  ;;  %v3507_v56 = vld [vmem:[%s4490_s6 + $0x8] sm:$0xff]   ;;  %v3508_v58 = vld [vmem:[%s4490_s6] sm:$0xff]  }
 0x5fb   :  { %v3563_v35 = vpop.eup %3562 }
 0x5fc   :  { %v2036_v0 = vadd.f32 1.0, %v3563_v35 }
 0x5fd   :  { %v3565_v12 = vpop.eup %3564 }
 0x5fe   :  { %3566 = vrcp.f32 %v2036_v0  ;;  %v2043_v30 = vadd.f32 1.0, %v3565_v12 }
 0x600   :  { %3568 = vrcp.f32 %v2043_v30 }
 0x60b   :  { %v3567_v49 = vpop.eup %3566 }
 0x60c   :  { %v2047_v39 = vmul.f32 %v3567_v49, %v2046_v4 }
 0x60d   :  { %v3569_v43 = vpop.eup %3568 }
 0x60e   :  { %v2048_v11 = vadd.f32 %v2047_v39, %v3972_v10  ;;  %v2050_v17 = vsub.f32 1.0, %v3569_v43  ;;  %v2052_v51 = vmul.f32 %v3569_v43, %v4301_v61  ;;  %v3493_v10 = vld [vmem:[%s4485_s3 + $0x98] ss:$12 sps:$4 sm:$0xff]  }
 0x610   :  { %3570 = vtanh.f32 %v2048_v11 }
 0x61d   :  { %v3571_v37 = vpop.eup %3570 }
 0x61e   :  { %v2051_v28 = vmul.f32 %v3571_v37, %v2050_v17 }
 0x620   :  { %v4361_v3 = vadd.f32 %v2052_v51, %v2051_v28 }
 0x622   :  { %v2054_v62 = vpack.c.bf16 %v4361_v3, %v4361_v3 }
 0x624   :  { %2055 = vst [vmem:[#allocation4 + $0x14] sm:$0xf] %v2054_v62  ;;  %2258 = vmatmul.mubr.bf16.vlgmr.msra.gmra.mxu0 %v2054_v62  ;;  %3302 = vmatmul.mubr.bf16.vlgmr.msra.gmra.mxu1 %v2054_v62 }
 0x625   :  { %2500 = vmatpush1.bf16.msra.mxu0 %v4055_v9  ;;  %2531 = vmatprep.mubr.bf16.mxu0 %v3593_v1  ;;  %v3492_v1 = vld [vmem:[%s4485_s3 + $0xb0] ss:$12 sps:$4 sm:$0xff]   ;;  %v3494_v9 = vld [vmem:[%s4485_s3 + $0x80] ss:$12 sps:$4 sm:$0xff]  }
 0x626   :  { %2501 = vmatprep.subr.bf16.mxu0 %v4065_v2  ;;  %3321 = vmatprep.mubr.msk.bf16.mxu1 %vm3595_vm0, %v3594_v48  ;;  %v3495_v2 = vld [vmem:[%s4485_s3 + $0x68] ss:$12 sps:$4 sm:$0xff]  }
 0x627   :  { %3306 = vmatpush3.bf16.msra.mxu1 %v3492_v1 }
 0x628   :  { %3307 = vmatprep.subr.bf16.mxu1 %v3594_v48 }
 0x629   :  { %2502 = vmatpush1.bf16.msra.mxu0 %v4071_v24  ;;  %v3496_v24 = vld [vmem:[%s4485_s3 + $0x50] ss:$12 sps:$4 sm:$0xff]  }
 0x62a   :  { %2503 = vmatprep.subr.bf16.mxu0 %v4081_v5  ;;  %v3500_v5 = vld [vmem:[%s4490_s6 + $0x38] sm:$0xff]  }
 0x62b   :  { %3308 = vmatpush3.bf16.msra.mxu1 %v3493_v10  ;;  %v3510_v29 = vld [vmem:[#allocation4 + $0x10] sm:$0xff]  }
 0x62c   :  { %3309 = vmatprep.subr.bf16.mxu1 %v3594_v48 }
 0x62d   :  { %2504 = vmatpush1.bf16.msra.mxu0 %v4087_v33  ;;  %v3497_v33 = vld [vmem:[%s4485_s3 + $0x38] ss:$12 sps:$4 sm:$0xff]  }
 0x62e   :  { %2505 = vmatprep.subr.bf16.mxu0 %v4097_v7  ;;  %v3498_v7 = vld [vmem:[%s4485_s3 + $0x20] ss:$12 sps:$4 sm:$0xff]  }
 0x62f   :  { %3310 = vmatpush3.bf16.msra.mxu1 %v3494_v9  ;;  %v3592_v9 = vld [vmem:[%s4489_s5] ss:$0 sm:$0xff] }
 0x630   :  { %3311 = vmatprep.subr.bf16.mxu1 %v3594_v48 }
 0x631   :  { %2506 = vmatpush1.bf16.msra.mxu0 %v4103_v8  ;;  %v3499_v8 = vld [vmem:[%s4485_s3 + $0x8] ss:$12 sps:$4 sm:$0xff]  }
 0x632   :  { %2507 = vmatprep.subr.bf16.mxu0 %v4112_v13 }
 0x633   :  { %3312 = vmatpush3.bf16.msra.mxu1 %v3495_v2 }
 0x634   :  { %3313 = vmatprep.subr.bf16.mxu1 %v3594_v48 }
 0x635   :  { %2508 = vmatpush1.bf16.msra.mxu0 %v4118_v14 }
 0x636   :  { %2509 = vmatprep.subr.bf16.mxu0 %v4128_v18 }
 0x637   :  { %3314 = vmatpush3.bf16.msra.mxu1 %v3496_v24 }
 0x638   :  { %3315 = vmatprep.subr.bf16.mxu1 %v3594_v48 }
 0x639   :  { %2510 = vmatpush1.bf16.msra.mxu0 %v4134_v21 }
 0x63a   :  { %2511 = vmatprep.subr.bf16.mxu0 %v4144_v25 }
 0x63b   :  { %3316 = vmatpush3.bf16.msra.mxu1 %v3497_v33 }
 0x63c   :  { %3317 = vmatprep.subr.bf16.mxu1 %v3594_v48 }
 0x63d   :  { %2512 = vmatpush1.bf16.msra.mxu0 %v4150_v26 }
 0x63e   :  { %2513 = vmatprep.subr.bf16.mxu0 %v4160_v31 }
 0x63f   :  { %3318 = vmatpush3.bf16.msra.mxu1 %v3498_v7 }
 0x640   :  { %3319 = vmatprep.subr.bf16.mxu1 %v3594_v48 }
 0x641   :  { %2514 = vmatpush1.bf16.msra.mxu0 %v4166_v32 }
 0x642   :  { %3325 = vmatprep.subr.bf16.mxu0 %v3500_v5 }
 0x643   :  { %3320 = vmatpush3.bf16.msra.mxu1 %v3499_v8 }
 0x6e4   :  { %v2259_v13 = vpop.f32.mrf.mxu0  ;;  %v2300_v14 = vpop.f32.mrf.mxu1 }
 0x6e5   :  { %v2306_v18 = vadd.f32 %v2259_v13, %v3952_v54  ;;  %v2320_v27 = vadd.f32 %v3977_v46, %v2300_v14  ;;  %v3502_v46 = vld [vmem:[%s4490_s6 + $0x30] sm:$0xff]  }
 0x6e6   :  { %v2261_v21 = vpop.f32.mrf.mxu0  ;;  %v3303_v25 = vpop.f32.mrf.mxu1 }
 0x6e7   :  { %v3004_v26 = vmul.f32 -1.442695, %v2306_v18  ;;  %v2313_v61 = vadd.f32 %v2261_v21, %v3954_v57 }
 0x6e8   :  { %v2263_v31 = vpop.f32.mrf.mxu0  ;;  %v2303_v32 = vpop.f32.mrf.mxu1 }
 0x6e9   :  { %3572 = vpow2.f32 %v3004_v26  ;;  %v3005_v16 = vmul.f32 -1.442695, %v2313_v61 }
 0x6ea   :  { %v2264_v41 = vpop.f32.mrf.mxu0  ;;  %v3304_v45 = vpop.f32.mrf.mxu1 }
 0x6eb   :  { %3574 = vpow2.f32 %v3005_v16 }
 0x6f6   :  { %v3573_v36 = vpop.eup %3572 }
 0x6f7   :  { %v2310_v34 = vadd.f32 1.0, %v3573_v36 }
 0x6f8   :  { %v3575_v48 = vpop.eup %3574 }
 0x6f9   :  { %3576 = vrcp.f32 %v2310_v34  ;;  %v2317_v22 = vadd.f32 1.0, %v3575_v48 }
 0x6fb   :  { %3578 = vrcp.f32 %v2317_v22 }
 0x706   :  { %v3577_v54 = vpop.eup %3576 }
 0x707   :  { %v2321_v6 = vmul.f32 %v3577_v54, %v2320_v27 }
 0x708   :  { %v3579_v42 = vpop.eup %3578 }
 0x709   :  { %v2322_v38 = vadd.f32 %v2321_v6, %v3966_v15  ;;  %v2324_v44 = vsub.f32 1.0, %v3579_v42  ;;  %v2326_v57 = vmul.f32 %v3579_v42, %v4361_v3  ;;  %v3503_v15 = vld [vmem:[%s4490_s6 + $0x28] sm:$0xff]  }
 0x70b   :  { %3580 = vtanh.f32 %v2322_v38 }
 0x718   :  { %v3581_v20 = vpop.eup %3580 }
 0x719   :  { %v2325_v19 = vmul.f32 %v3581_v20, %v2324_v44 }
 0x71b   :  { %v4422_v47 = vadd.f32 %v2326_v57, %v2325_v19 }
 0x71d   :  { %v2328_v50 = vpack.c.bf16 %v4422_v47, %v4422_v47 }
 0x71f   :  { %2329 = vst [vmem:[#allocation4 + $0x18] sm:$0xf] %v2328_v50  ;;  %2532 = vmatmul.mubr.bf16.vlgmr.msra.gmra.mxu0 %v2328_v50  ;;  %3322 = vmatmul.mubr.bf16.vlgmr.msra.gmra.mxu1 %v2328_v50 }
 0x720   :  { %3326 = vmatpush3.bf16.msra.mxu0 %v3500_v5  ;;  %3341 = vmatprep.mubr.bf16.mxu0 %v3501_v23 }
 0x721   :  { %3327 = vmatprep.subr.bf16.mxu0 %v3502_v46 }
 0x724   :  { %3328 = vmatpush3.bf16.msra.mxu0 %v3502_v46 }
 0x725   :  { %3329 = vmatprep.subr.bf16.mxu0 %v3503_v15 }
 0x728   :  { %3330 = vmatpush3.bf16.msra.mxu0 %v3503_v15 }
 0x729   :  { %3331 = vmatprep.subr.bf16.mxu0 %v3504_v52 }
 0x72c   :  { %3332 = vmatpush3.bf16.msra.mxu0 %v3504_v52 }
 0x72d   :  { %3333 = vmatprep.subr.bf16.mxu0 %v3505_v53 }
 0x730   :  { %3334 = vmatpush3.bf16.msra.mxu0 %v3505_v53 }
 0x731   :  { %3335 = vmatprep.subr.bf16.mxu0 %v3506_v55 }
 0x734   :  { %3336 = vmatpush3.bf16.msra.mxu0 %v3506_v55 }
 0x735   :  { %3337 = vmatprep.subr.bf16.mxu0 %v3507_v56 }
 0x738   :  { %3338 = vmatpush3.bf16.msra.mxu0 %v3507_v56 }
 0x739   :  { %3339 = vmatprep.subr.bf16.mxu0 %v3508_v58 }
 0x73c   :  { %3340 = vmatpush3.bf16.msra.mxu0 %v3508_v58 }
 0x73f   :  { %3342 = vmatmul.mubr.bf16.vlgmr.msra.gmra.mxu0 %v3509_v59 }
 0x740   :  { %3345 = vmatprep.mubr.bf16.mxu0 %v3510_v29 }
 0x7df   :  { %v2533_v35 = vpop.f32.mrf.mxu0  ;;  %v2574_v0 = vpop.f32.mrf.mxu1 }
 0x7e0   :  { %v2580_v12 = vadd.f32 %v2533_v35, %v3956_v60  ;;  %v3032_v60 = vld [vmem:[%s4491_s7] ss:$0 sm:$0xff]  ;;  %v2594_v2 = vadd.f32 %v3592_v9, %v2574_v0 }
 0x7e1   :  { %v2535_v30 = vpop.f32.mrf.mxu0  ;;  %v3323_v4 = vpop.f32.mrf.mxu1 }
 0x7e2   :  { %v3030_v49 = vmul.f32 -1.442695, %v2580_v12  ;;  %v2587_v37 = vadd.f32 %v2535_v30, %v3958_v63 }
 0x7e3   :  { %v2537_v39 = vpop.f32.mrf.mxu0  ;;  %v2577_v11 = vpop.f32.mrf.mxu1 }
 0x7e4   :  { %3582 = vpow2.f32 %v3030_v49  ;;  %v3031_v28 = vmul.f32 -1.442695, %v2587_v37 }
 0x7e5   :  { %v2538_v43 = vpop.f32.mrf.mxu0  ;;  %v3324_v17 = vpop.f32.mrf.mxu1 }
 0x7e6   :  { %3584 = vpow2.f32 %v3031_v28 }
 0x7f1   :  { %v3583_v51 = vpop.eup %3582 }
 0x7f2   :  { %v2584_v3 = vadd.f32 1.0, %v3583_v51 }
 0x7f3   :  { %v3585_v62 = vpop.eup %3584 }
 0x7f4   :  { %3586 = vrcp.f32 %v2584_v3  ;;  %v2591_v1 = vadd.f32 1.0, %v3585_v62 }
 0x7f6   :  { %3588 = vrcp.f32 %v2591_v1 }
 0x7ff   :  { %v3343_v10 = vpop.f32.mrf.mxu0 }
 0x800   :  { %v2757_v24 = vadd.f32 %v3343_v10, %v3032_v60 }
 0x801   :  { %v3587_v5 = vpop.eup %3586  ;;  %v2748_v63 = vpop.f32.mrf.mxu0 }
 0x802   :  { %v2595_v33 = vmul.f32 %v3587_v5, %v2594_v2  ;;  %2781 = vst [vmem:[%s4492_s8 + $0x10] sm:$0xff] %v2757_v24  ;;  %v2749_v7 = vadd.f32 %v3032_v60, %v2748_v63 }
 0x803   :  { %v3344_v8 = vpop.f32.mrf.mxu0  ;;  %v3589_v25 = vpop.eup %3588 }
 0x804   :  { %v2596_v13 = vadd.f32 %v2595_v33, %v3970_v40  ;;  %2779 = vst [vmem:[%s4492_s8] sm:$0xff] %v2749_v7  ;;  %v2760_v14 = vadd.f32 %v3344_v8, %v3032_v60  ;;  %v2598_v26 = vsub.f32 1.0, %v3589_v25  ;;  %v2600_v32 = vmul.f32 %v3589_v25, %v4422_v47 }
 0x805   :  { %v2751_v18 = vpop.f32.mrf.mxu0 }
 0x806   :  { %3590 = vtanh.f32 %v2596_v13  ;;  %2782 = vst [vmem:[%s4492_s8 + $0x18] sm:$0xff] %v2760_v14  ;;  %v2752_v21 = vadd.f32 %v3032_v60, %v2751_v18 }
 0x808   :  { %2780 = vst [vmem:[%s4492_s8 + $0x8] sm:$0xff] %v2752_v21 }
 0x813   :  { %v3591_v31 = vpop.eup %3590 }
 0x814   :  { %v2599_v40 = vmul.f32 %v3591_v31, %v2598_v26 }
 0x816   :  { %v2601_v41 = vadd.f32 %v2600_v32, %v2599_v40 }
 0x818   :  { %v2602_v45 = vpack.c.bf16 %v2601_v41, %v2601_v41  ;;  %2609 = vst [vmem:[%s4493_s9] sm:$0xff] %v2601_v41 }
 0x81a   :  { %2603 = vst [vmem:[#allocation4 + $0x1c] sm:$0xf] %v2602_v45 }
 0x821   :  { %v3511_v61 = vld [vmem:[#allocation4 + $0x18] sm:$0xff]  }
 0x822   :  { %3346 = vmatmul.mubr.bf16.gmra.mxu0 %v3511_v61 }
 0x8e2   :  { %v3347_v16 = vpop.f32.mrf.mxu0 }
 0x8e3   :  { %v2773_v36 = vadd.f32 %v3347_v16, %v3032_v60 }
 0x8e4   :  { %v2764_v34 = vpop.f32.mrf.mxu0 }
 0x8e5   :  { %2785 = vst [vmem:[%s4492_s8 + $0x30] sm:$0xff] %v2773_v36  ;;  %v2765_v48 = vadd.f32 %v3032_v60, %v2764_v34 }
 0x8e6   :  { %v3348_v22 = vpop.f32.mrf.mxu0 }
 0x8e7   :  { %2783 = vst [vmem:[%s4492_s8 + $0x20] sm:$0xff] %v2765_v48  ;;  %v2776_v27 = vadd.f32 %v3348_v22, %v3032_v60 }
 0x8e8   :  { %v2767_v54 = vpop.f32.mrf.mxu0 }
 0x8e9   :  { %2786 = vst [vmem:[%s4492_s8 + $0x38] sm:$0xff] %v2776_v27  ;;  %v2768_v6 = vadd.f32 %v3032_v60, %v2767_v54 }
 0x8eb   :  { %2784 = vst [vmem:[%s4492_s8 + $0x28] sm:$0xff] %v2768_v6 }

</bundles_post_ra>
